<compile_context>
chip_gen: v7x
topology: tpu7x:2x2x1
jax: 0.10.0
libtpu: 0.0.40
codegen_flags: <defaults>
</compile_context>

<pallas_src>
import jax
import jax.numpy as jnp
from jax.experimental import pallas as pl
from jax.experimental.pallas import tpu as pltpu

CONT = 22                    # continuous state size
DISC = 2                     # discrete state size
RAW = CONT + DISC            # 24 raw state features
CTXE = 3 * RAW               # 72 = [state | sin(state) | cos(state)]
CTX = RAW + 10               # 34 = original context width (state + 5 sin + 5 cos)
H = 256                      # hidden width
ANGLE_IDX = (0, 4, 6, 8, 10)


# ----------------------------- Pallas kernel -----------------------------------
def _mlp_kernel(state_ref, wctx_ref, bctx_ref, w2a_ref, w3a_ref, w3b_ref, b3_ref,
                out_ref):
    # state_ref: (RAW, TB) f32, batch lives on the lane axis.
    s = state_ref[...]
    # Fused feature transform: sin/cos of every state column (EUP).  The original
    # gather of angle columns [0,4,6,8,10] lives entirely in the weight packing.
    ctx = jnp.concatenate([s, jnp.sin(s), jnp.cos(s)], axis=0)            # (72, TB)

    # Layer 0 and the layer-1 context term share one merged short-K matmul.
    pre = jnp.dot(wctx_ref[...], ctx, preferred_element_type=jnp.float32)
    pre = pre + bctx_ref[...]                                             # (512, TB)
    h1 = jnp.maximum(pre[:H, :], 0.0)                                     # (256, TB)
    l1_ctx = pre[H:, :]                                                   # (256, TB), b2 included

    # TODO(synk): CBPLinear is an identity pass-through in the forward pass; its
    # utility tracking / neuron resets are training-time side effects with no
    # inference-kernel equivalent, so they are omitted here.

    # Layer 1: Linear(290 -> 256) + ReLU as split matmuls (h1 part + ctx part).
    h2 = jnp.dot(w2a_ref[...], h1, preferred_element_type=jnp.float32) + l1_ctx
    h2 = jnp.maximum(h2, 0.0)                                             # (256, TB)

    # Layer 2 (value head): natively lane-dense (1, TB) row.
    v = (jnp.dot(w3a_ref[...], h2, preferred_element_type=jnp.float32)
         + jnp.dot(w3b_ref[...], ctx, preferred_element_type=jnp.float32)
         + b3_ref[0, 0])
    out_ref[...] = v                                                      # (1, TB) f32


# ----------------------------- parameter packing --------------------------------
def make_params(key):
    """PyTorch-style nn.Linear init: U(-1/sqrt(fan_in), 1/sqrt(fan_in))."""
    ks = jax.random.split(key, 6)

    def lin(kw, kb, out_f, in_f):
        bound = 1.0 / jnp.sqrt(jnp.float32(in_f))
        w = jax.random.uniform(kw, (out_f, in_f), jnp.float32, -bound, bound)
        b = jax.random.uniform(kb, (out_f,), jnp.float32, -bound, bound)
        return w, b

    w1, b1 = lin(ks[0], ks[1], H, CTX)          # (256, 34), (256,)
    w2, b2 = lin(ks[2], ks[3], H, H + CTX)      # (256, 290), (256,)
    w3, b3 = lin(ks[4], ks[5], 1, H + CTX)      # (1, 290), (1,)
    return (w1, b1, w2, b2, w3, b3)


def _extend_ctx_weight(w_ctx):
    """Map a (out, 34) context weight onto the 72-wide [state|sin|cos] features."""
    out_f = w_ctx.shape[0]
    w_ext = jnp.zeros((out_f, CTXE), jnp.float32)
    w_ext = w_ext.at[:, :RAW].set(w_ctx[:, :RAW])                 # raw state part
    for j, idx in enumerate(ANGLE_IDX):
        w_ext = w_ext.at[:, RAW + idx].set(w_ctx[:, RAW + j])     # sin(angle_j)
        w_ext = w_ext.at[:, 2 * RAW + idx].set(w_ctx[:, RAW + 5 + j])  # cos(angle_j)
    return w_ext


def prepare_params(params):
    """One-time repack of the PyTorch-layout weights for the kernel (call once)."""
    w1, b1, w2, b2, w3, b3 = params

    w1_ext = _extend_ctx_weight(w1)                                # (256, 72)
    w2a = w2[:, :H].astype(jnp.float32)                            # (256, 256)
    w2b_ext = _extend_ctx_weight(w2[:, H:])                        # (256, 72)
    w3a = w3[:, :H].astype(jnp.float32)                            # (1, 256)
    w3b_ext = _extend_ctx_weight(w3[:, H:])                        # (1, 72)

    # Merged context slab: rows 0..255 -> layer-0 preact, rows 256..511 -> layer-1
    # context term.  Bias slab merged the same way (b2 added early is equivalent).
    wctx = jnp.concatenate([w1_ext, w2b_ext], axis=0)              # (512, 72)
    bctx = jnp.concatenate([b1, b2])[:, None].astype(jnp.float32)  # (512, 1)
    b3_p = b3.reshape(1, 1).astype(jnp.float32)                    # (1, 1) -> SMEM

    return (wctx, bctx, w2a, w3a, w3b_ext, b3_p)


# ----------------------------- wrapper ------------------------------------------
def _round_up(x, m):
    return ((x + m - 1) // m) * m


def _pick_tile(n):
    """Lane tile: multiple of 128, >=2 grid steps when possible, <=512 lanes/step."""
    n128 = _round_up(max(n, 1), 128)
    if n128 <= 128:
        return 128
    return min(512, max(128, ((n128 // 2) // 128) * 128))


@jax.jit
def walker_value_forward(cont_state, disc_state, packed_params):
    wctx, bctx, w2a, w3a, w3b, b3 = packed_params
    n = cont_state.shape[0]
    tb = _pick_tile(n)
    n_pad = _round_up(n, tb)

    # Only wrapper-side prep: raw 24-wide state, transposed (batch -> lanes) and
    # lane-padded to the tile multiple.  Padded columns are zero (see header note).
    state_t = jnp.concatenate([cont_state, disc_state], axis=1).T          # (24, n)
    state_p = jnp.pad(state_t, ((0, 0), (0, n_pad - n)))                   # (24, n_pad)

    grid = (n_pad // tb,)
    full = lambda a: pl.BlockSpec(a.shape, lambda i: (0, 0))

    cost = pl.CostEstimate(
        flops=2 * n_pad * (wctx.shape[0] * wctx.shape[1] + H * H + H + CTXE),
        transcendentals=2 * RAW * n_pad,
        bytes_accessed=4 * (RAW * n_pad + n_pad + wctx.size + bctx.size
                            + w2a.size + w3a.size + w3b.size + 1),
    )

    out = pl.pallas_call(
        _mlp_kernel,
        out_shape=jax.ShapeDtypeStruct((1, n_pad), jnp.float32),
        grid_spec=pltpu.PrefetchScalarGridSpec(
            num_scalar_prefetch=0,
            grid=grid,
            in_specs=[
                pl.BlockSpec((RAW, tb), lambda i: (0, i)),                 # state tile
                full(wctx), full(bctx),                                    # merged ctx slab
                full(w2a),                                                 # layer-1 h1 part
                full(w3a), full(w3b),                                      # value head
                pl.BlockSpec(memory_space=pltpu.MemorySpace.SMEM),         # b3 scalar
            ],
            out_specs=pl.BlockSpec((1, tb), lambda i: (0, i)),             # lane-dense out
        ),
        compiler_params=pltpu.CompilerParams(dimension_semantics=("parallel",)),
        cost_estimate=cost,
    )(state_p, wctx, bctx, w2a, w3a, w3b, b3)

    return out[0, :n]                                                      # (N,) == pred.squeeze(1)


# ----------------------------- reference (plain JAX, f32) ------------------------
def _build_context(cont_state, disc_state):
    state = jnp.concatenate([cont_state, disc_state], axis=1)              # (N, 24)
    angles = state[:, jnp.array(ANGLE_IDX)]                                # (N, 5)
    return jnp.concatenate([state, jnp.sin(angles), jnp.cos(angles)], axis=1)  # (N, 34)


def walker_value_reference(cont_state, disc_state, params):
    w1, b1, w2, b2, w3, b3 = params
    ctx = _build_context(cont_state, disc_state)
    h1 = jnp.maximum(ctx @ w1.T + b1, 0.0)
    x2 = jnp.concatenate([h1, ctx], axis=1)          # cbp[0] == identity
    h2 = jnp.maximum(x2 @ w2.T + b2, 0.0)
    x3 = jnp.concatenate([h2, ctx], axis=1)          # cbp[0] == identity
    return (x3 @ w3.T + b3)[:, 0]


if __name__ == "__main__":
    key = jax.random.PRNGKey(0)
    k_param, k_cont, k_disc = jax.random.split(key, 3)

    N = 333                                      # exercises lane padding + a 3-step grid
    params = make_params(k_param)
    packed = prepare_params(params)              # one-time repack (not per forward call)

    cont_state = jax.random.normal(k_cont, (N, CONT), jnp.float32)
    disc_state = jax.random.bernoulli(k_disc, 0.5, (N, DISC)).astype(jnp.float32)

    out = walker_value_forward(cont_state, disc_state, packed)
    out = jax.block_until_ready(out)

    ref = walker_value_reference(cont_state, disc_state, params)
    assert out.shape == (N,), out.shape
    # f32 everywhere now; tolerance only covers XLA-default-precision differences
    # between the reference matmuls and the MXU kernel.
    assert jnp.allclose(out, ref, atol=1e-2, rtol=1e-2), (
        float(jnp.max(jnp.abs(out - ref))))

    print("KERNEL_OK")
</pallas_src>

<mosaic_0001>
module attributes {stable_mosaic.version = 11 : i64} {
  func.func @_mlp_kernel(%arg0: i32, %arg1: memref<24x128xf32, #tpu.memory_space<vmem>>, %arg2: memref<512x72xf32, #tpu.memory_space<vmem>>, %arg3: memref<512x1xf32, #tpu.memory_space<vmem>>, %arg4: memref<256x256xf32, #tpu.memory_space<vmem>>, %arg5: memref<1x256xf32, #tpu.memory_space<vmem>>, %arg6: memref<1x72xf32, #tpu.memory_space<vmem>>, %arg7: memref<1x1xf32, #tpu.memory_space<smem>>, %arg8: memref<1x128xf32, #tpu.memory_space<vmem>>) attributes {dimension_semantics = [#tpu.dimension_semantics<parallel>], iteration_bounds = array<i64: 3>, scalar_prefetch = 0 : i64, scratch_operands = 0 : i64, tpu.core_type = #tpu.core_type<tc>, window_params = [{transform_indices = @transform_0, window_bounds = array<i64: 24, 128>}, {pipeline_mode = #tpu.pipeline_mode<synchronous>, transform_indices = @transform_1, window_bounds = array<i64: 512, 72>}, {pipeline_mode = #tpu.pipeline_mode<synchronous>, transform_indices = @transform_2, window_bounds = array<i64: 512, 1>}, {pipeline_mode = #tpu.pipeline_mode<synchronous>, transform_indices = @transform_3, window_bounds = array<i64: 256, 256>}, {pipeline_mode = #tpu.pipeline_mode<synchronous>, transform_indices = @transform_4, window_bounds = array<i64: 1, 256>}, {pipeline_mode = #tpu.pipeline_mode<synchronous>, transform_indices = @transform_5, window_bounds = array<i64: 1, 72>}, {transform_indices = @transform_6, window_bounds = array<i64: 1, 1>}, {transform_indices = @transform_7, window_bounds = array<i64: 1, 128>}]} {
    %c0 = arith.constant 0 : index
    %c0_0 = arith.constant 0 : index
    %0 = vector.load %arg1[%c0, %c0_0] : memref<24x128xf32, #tpu.memory_space<vmem>>, vector<24x128xf32>
    %1 = math.sin %0 : vector<24x128xf32>
    %2 = math.cos %0 : vector<24x128xf32>
    %3 = tpu.concatenate %0, %1, %2 in 0 : vector<24x128xf32>, vector<24x128xf32>, vector<24x128xf32> -> vector<72x128xf32>
    %c0_1 = arith.constant 0 : index
    %c0_2 = arith.constant 0 : index
    %4 = vector.load %arg2[%c0_1, %c0_2] : memref<512x72xf32, #tpu.memory_space<vmem>>, vector<512x72xf32>
    %cst = arith.constant dense<0.000000e+00> : vector<512x128xf32>
    %5 = tpu.matmul %4, %3, %cst {dimension_numbers = #tpu.dot_dimension_numbers<[1], [0], [0], [1], [0, 0, 1, 1], [], []>} : vector<512x72xf32>, vector<72x128xf32>, vector<512x128xf32> -> vector<512x128xf32>
    %c0_3 = arith.constant 0 : index
    %c0_4 = arith.constant 0 : index
    %6 = vector.load %arg3[%c0_3, %c0_4] : memref<512x1xf32, #tpu.memory_space<vmem>>, vector<512x1xf32>
    %7 = vector.broadcast %6 : vector<512x1xf32> to vector<512x128xf32>
    %8 = arith.addf %5, %7 : vector<512x128xf32>
    %9 = vector.extract_strided_slice %8 {offsets = [0, 0], sizes = [256, 128], strides = [1, 1]} : vector<512x128xf32> to vector<256x128xf32>
    %cst_5 = arith.constant 0.000000e+00 : f32
    %10 = vector.broadcast %cst_5 : f32 to vector<256x128xf32>
    %11 = arith.maximumf %9, %10 : vector<256x128xf32>
    %12 = vector.extract_strided_slice %8 {offsets = [256, 0], sizes = [256, 128], strides = [1, 1]} : vector<512x128xf32> to vector<256x128xf32>
    %c0_6 = arith.constant 0 : index
    %c0_7 = arith.constant 0 : index
    %13 = vector.load %arg4[%c0_6, %c0_7] : memref<256x256xf32, #tpu.memory_space<vmem>>, vector<256x256xf32>
    %cst_8 = arith.constant dense<0.000000e+00> : vector<256x128xf32>
    %14 = tpu.matmul %13, %11, %cst_8 {dimension_numbers = #tpu.dot_dimension_numbers<[1], [0], [0], [1], [0, 0, 1, 1], [], []>} : vector<256x256xf32>, vector<256x128xf32>, vector<256x128xf32> -> vector<256x128xf32>
    %15 = arith.addf %14, %12 : vector<256x128xf32>
    %cst_9 = arith.constant 0.000000e+00 : f32
    %16 = vector.broadcast %cst_9 : f32 to vector<256x128xf32>
    %17 = arith.maximumf %15, %16 : vector<256x128xf32>
    %c0_10 = arith.constant 0 : index
    %c0_11 = arith.constant 0 : index
    %18 = vector.load %arg5[%c0_10, %c0_11] : memref<1x256xf32, #tpu.memory_space<vmem>>, vector<1x256xf32>
    %cst_12 = arith.constant dense<0.000000e+00> : vector<1x128xf32>
    %19 = tpu.matmul %18, %17, %cst_12 {dimension_numbers = #tpu.dot_dimension_numbers<[1], [0], [0], [1], [0, 0, 1, 1], [], []>} : vector<1x256xf32>, vector<256x128xf32>, vector<1x128xf32> -> vector<1x128xf32>
    %c0_13 = arith.constant 0 : index
    %c0_14 = arith.constant 0 : index
    %20 = vector.load %arg6[%c0_13, %c0_14] : memref<1x72xf32, #tpu.memory_space<vmem>>, vector<1x72xf32>
    %cst_15 = arith.constant dense<0.000000e+00> : vector<1x128xf32>
    %21 = tpu.matmul %20, %3, %cst_15 {dimension_numbers = #tpu.dot_dimension_numbers<[1], [0], [0], [1], [0, 0, 1, 1], [], []>} : vector<1x72xf32>, vector<72x128xf32>, vector<1x128xf32> -> vector<1x128xf32>
    %22 = arith.addf %19, %21 : vector<1x128xf32>
    %c0_16 = arith.constant 0 : index
    %c0_17 = arith.constant 0 : index
    %23 = memref.load %arg7[%c0_16, %c0_17] : memref<1x1xf32, #tpu.memory_space<smem>>
    %24 = vector.broadcast %23 : f32 to vector<1x128xf32>
    %25 = arith.addf %22, %24 : vector<1x128xf32>
    %c0_18 = arith.constant 0 : index
    %c0_19 = arith.constant 0 : index
    %26 = vector.load %arg8[%c0_18, %c0_19] : memref<1x128xf32, #tpu.memory_space<vmem>>, vector<1x128xf32>
    tpu.vector_store %arg8[%c0_18, %c0_19], %25 {strides = array<i32>} : memref<1x128xf32, #tpu.memory_space<vmem>>, vector<1x128xf32>,
    return
  }
  func.func @transform_0(%arg0: i32) -> (i32, i32) {
    %c0_i32 = arith.constant 0 : i32
    %c0_i32_0 = arith.constant 0 : i32
    return %c0_i32, %arg0 : i32, i32
  }
  func.func @transform_1(%arg0: i32) -> (i32, i32) {
    %c0_i32 = arith.constant 0 : i32
    %c0_i32_0 = arith.constant 0 : i32
    %c0_i32_1 = arith.constant 0 : i32
    return %c0_i32, %c0_i32_0 : i32, i32
  }
  func.func @transform_2(%arg0: i32) -> (i32, i32) {
    %c0_i32 = arith.constant 0 : i32
    %c0_i32_0 = arith.constant 0 : i32
    %c0_i32_1 = arith.constant 0 : i32
    return %c0_i32, %c0_i32_0 : i32, i32
  }
  func.func @transform_3(%arg0: i32) -> (i32, i32) {
    %c0_i32 = arith.constant 0 : i32
    %c0_i32_0 = arith.constant 0 : i32
    %c0_i32_1 = arith.constant 0 : i32
    return %c0_i32, %c0_i32_0 : i32, i32
  }
  func.func @transform_4(%arg0: i32) -> (i32, i32) {
    %c0_i32 = arith.constant 0 : i32
    %c0_i32_0 = arith.constant 0 : i32
    %c0_i32_1 = arith.constant 0 : i32
    return %c0_i32, %c0_i32_0 : i32, i32
  }
  func.func @transform_5(%arg0: i32) -> (i32, i32) {
    %c0_i32 = arith.constant 0 : i32
    %c0_i32_0 = arith.constant 0 : i32
    %c0_i32_1 = arith.constant 0 : i32
    return %c0_i32, %c0_i32_0 : i32, i32
  }
  func.func @transform_6(%arg0: i32) -> (i32, i32) {
    %c0_i32 = arith.constant 0 : i32
    %c0_i32_0 = arith.constant 0 : i32
    %c0_i32_1 = arith.constant 0 : i32
    return %c0_i32, %c0_i32_0 : i32, i32
  }
  func.func @transform_7(%arg0: i32) -> (i32, i32) {
    %c0_i32 = arith.constant 0 : i32
    %c0_i32_0 = arith.constant 0 : i32
    return %c0_i32, %arg0 : i32, i32
  }
}

</mosaic_0001>

<bundles_post_ra>
// kernel: walker_value_forward.1
= control target key start
LH: loop header
LB: loop body
LE: loop exit
PB: predicated region body
PF: predicated region fallthrough
CT: control target
= control target key end

     0   :  { %s4326_s0 = inlined_call_operand.vmem [shape: f32[24,384], index: 0, kind: input, shape index: {}]   ;;  %s4327_s1 = inlined_call_operand.vmem [shape: f32[512,72], index: 1, kind: input, shape index: {}]   ;;  %s4328_s2 = inlined_call_operand.vmem [shape: f32[512,1], index: 2, kind: input, shape index: {}]   ;;  %s4329_s3 = inlined_call_operand.vmem [shape: f32[256,256], index: 3, kind: input, shape index: {}]   ;;  %s4330_s4 = inlined_call_operand.vmem [shape: f32[1,256], index: 4, kind: input, shape index: {}]   ;;  %s4331_s5 = inlined_call_operand.vmem [shape: f32[1,72], index: 5, kind: input, shape index: {}]   ;;  %s4332_s6 = inlined_call_operand.<no memory space> [shape: f32[1,1], index: 6, kind: input, shape index: {}]   ;;  %s4333_s7 = inlined_call_operand.vmem [shape: f32[1,384], index: 7, kind: output, shape index: {}]  }
   0x1   :  { %12 = sst [smem:[#allocation2]] %s4332_s6 }
   0x2   :  { %s3131_s26 = smov 0   ;;  %s3133_s27 = smov 0  }
   0x3   :  { %s3135_s28 = smov 0  }
   0x4 LB: > { %s2534_s6 = sadd.s32 4294967295, %s3076_s28   ;;  %s3148_s29 = sadd.s32 1, %s3076_s28   ;;  %s3076_s28 = sphi %s3135_s28, %s4338_s28   ;;  %s3072_s27 = sphi %s3133_s27, %s4337_s27   ;;  %s3068_s26 = sphi %s3131_s26, %s4336_s26  }
   0x5   : > { %s22_s30 = ssub.s32 %s3076_s28, %s3148_s29  ;;  %s25_s8 = sadd.s32 1, %s3072_s27 }
   0x6   : > { %p23_p0 = scmp.eq.s32.totalorder %s22_s30, 0  ;;  %p32_p1 = scmp.ne.s32.totalorder %s3072_s27, %s3068_s26 }
   0x7   : > { %p33_p2 = scmp.eq.s32.totalorder %s3076_s28, 0  ;;  %p2537_p4 = scmp.ge.s32.totalorder %s3076_s28, 3 }
   0x8   : > { %s3157_s9 = scalar_select %p23_p0, %s3072_s27, %s25_s8  }
   0x9   : > { %p34_p3 = por %p33_p2, %p32_p1  ;;  %228 = sbr.rel (%p2537_p4) target bundleno = 23 (0x17), region = 40 }
  0x10   : > { %231 = sbr.rel (!%p34_p3) target bundleno = 23 (0x17), region = 44  ;;  %s233_s10 = sand.u32 (%p34_p3), 1, %s3072_s27  }
  0x11   : > { %s2538_s11 = sshll.u32 (%p34_p3), %s3076_s28, 3  ;;  %s2992_s12 = smul.u32 (%p34_p3), 24, %s233_s10 }
  0x12   : > { %s237_s15 = scalar_lea.vmem (%p34_p3), %s4326_s0, %s2538_s11 }
  0x13   : > { %v269_v0 = vld [vmem:[%s237_s15] sm:$0xff] (%p34_p3)  ;;  %v271_v1 = vld [vmem:[%s237_s15 + $0x18] sm:$0xff] (%p34_p3)  ;;  %v273_v2 = vld [vmem:[%s237_s15 + $0x30] sm:$0xff] (%p34_p3)  ;;  %s235_s16 = scalar_lea.vmem (%p34_p3), [#allocation3], %s2992_s12 }
  0x14   : > { %270 = vst [vmem:[%s235_s16] sm:$0xff] (%p34_p3), %v269_v0  ;;  %272 = vst [vmem:[%s235_s16 + $0x8] sm:$0xff] (%p34_p3), %v271_v1 }
  0x15   : > { %274 = vst [vmem:[%s235_s16 + $0x10] sm:$0xff] (%p34_p3), %v273_v2 }
  0x17 PF: > { %p2539_p5 = scmp.ge.s32.totalorder %s3076_s28, 1  ;;  %p279_p6 = scmp.lt.s32.totalorder %s3076_s28, 4 }
  0x19   : > { %p280_p7 = pnand %p2539_p5, %p279_p6 }
  0x1a   : > { %v1006_v3 = vld [vmem:[%s4328_s2] sm:$0xff] (!%p280_p7)  ;;  %v1008_v4 = vld [vmem:[%s4328_s2 + $0x10] sm:$0xff] (!%p280_p7)  ;;  %s286_s21 = sand.u32 (!%p280_p7), 1, %s3068_s26   ;;  %v3078_v5 = vmov (!%p280_p7), 0   ;;  %v1007_v6 = vld [vmem:[%s4328_s2 + $0x8] sm:$0xff] (!%p280_p7)  ;;  %vm1390_vm0 = vcmask (!%p280_p7), 588800  }
  0x1b   : > { %283 = sbr.rel (%p280_p7) target bundleno = 998 (0x3e6), region = 82  ;;  %3040 = vset.pattern.permute.xlu0 (!%p280_p7), %v3078_v5  ;;  %3041 = vset.pattern.permute.xlu1 (!%p280_p7), %v3078_v5  ;;  %v1009_v7 = vld [vmem:[%s4328_s2 + $0x18] sm:$0xff] (!%p280_p7)  ;;  %v1010_v15 = vld [vmem:[%s4328_s2 + $0x20] sm:$0xff] (!%p280_p7)  ;;  %v1011_v16 = vld [vmem:[%s4328_s2 + $0x28] sm:$0xff] (!%p280_p7)  ;;  %v3079_v45 = vmov (!%p280_p7), 683565275  }
  0x1c   : > { %s2993_s22 = smul.u32 (!%p280_p7), 24, %s286_s21  ;;  %1072 = vperm.xlu0 (!%p280_p7), %3040, %v1006_v3   ;;  %1082 = vperm.xlu1 (!%p280_p7), %3041, %v1008_v4   ;;  %v1012_v26 = vld [vmem:[%s4328_s2 + $0x30] sm:$0xff] (!%p280_p7)  ;;  %v1013_v27 = vld [vmem:[%s4328_s2 + $0x38] sm:$0xff] (!%p280_p7)  ;;  %v942_v33 = vld [vmem:[%s4327_s1] sm:$0xff] (!%p280_p7)  ;;  %v3080_v47 = vmov (!%p280_p7), 2475754826  }
  0x1d   : > { %v1014_v34 = vld [vmem:[%s4328_s2 + $0x40] sm:$0xff] (!%p280_p7)  ;;  %v1015_v38 = vld [vmem:[%s4328_s2 + $0x48] sm:$0xff] (!%p280_p7)  ;;  %2767 = vmatprep.mubr.msk.f32.mxu0 (!%p280_p7), %vm1390_vm0, %v942_v33  ;;  %v3081_v49 = vmov (!%p280_p7), 2131351028   ;;  %v3082_v51 = vmov (!%p280_p7), 2102212464  }
  0x1e   : > { %s288_s8 = scalar_lea.vmem (!%p280_p7), [#allocation3], %s2993_s22  ;;  %v3083_v53 = vmov (!%p280_p7), 920167782   ;;  %v1016_v55 = vld [vmem:[%s4328_s2 + $0x50] sm:$0xff] (!%p280_p7)  ;;  %v1017_v56 = vld [vmem:[%s4328_s2 + $0x58] sm:$0xff] (!%p280_p7)  ;;  %s2477_s26 = sld [smem:[#allocation2]] (!%p280_p7) }
  0x1f   : > { %v3180_v8 = vld [vmem:[%s288_s8] sm:$0xff] (!%p280_p7)  ;;  %v3182_v9 = vld [vmem:[%s288_s8 + $0x8] sm:$0xff] (!%p280_p7)  ;;  %v3190_v13 = vld [vmem:[%s288_s8 + $0x10] sm:$0xff] (!%p280_p7)  ;;  %v3084_v62 = vmov (!%p280_p7), 1326507024   ;;  %p315_p8 = scmp.lt.s32.totalorder (!%p280_p7), %s2534_s6, 2 }
  0x20   : > { %v324_v10 = vand.u32 (!%p280_p7), 2139095040, %v3180_v8  ;;  %v428_v11 = vand.u32 (!%p280_p7), 2139095040, %v3182_v9  ;;  %v3188_v12 = vpack.c.bf16 (!%p280_p7), %v3182_v9, %v3180_v8  ;;  %1077 = vperm.xlu0 (!%p280_p7), %3040, %v1007_v6   ;;  %1087 = vperm.xlu1 (!%p280_p7), %3041, %v1009_v7   ;;  %v321_v14 = vand.u32 (!%p280_p7), 2147483647, %v3180_v8  ;;  %v1018_v6 = vld [vmem:[%s4328_s2 + $0x60] sm:$0xff] (!%p280_p7)  ;;  %v1019_v7 = vld [vmem:[%s4328_s2 + $0x68] sm:$0xff] (!%p280_p7) }
  0x21   : > { %v532_v19 = vand.u32 (!%p280_p7), 2139095040, %v3190_v13  ;;  %v425_v21 = vand.u32 (!%p280_p7), 2147483647, %v3182_v9 }
  0x22   : > { %v325_v17 = vshrl.u32 %v324_v10, 23  ;;  %v429_v18 = vshrl.u32 %v428_v11, 23  ;;  %2885 = vmatprep.subr.bf16.mxu0 %v3188_v12  ;;  %v328_v20 = vand.u32 8388607, %v321_v14  ;;  %s4340_s6 = smov (!%p315_p8, %s2534_s6), 2 }
  0x23   : > { %2887 = vmatpush3.bf16.msra.mxu0 %v3188_v12  ;;  %v533_v24 = vshrl.u32 %v532_v19, 23  ;;  %v432_v25 = vand.u32 8388607, %v425_v21  ;;  %s317_s12 = scalar_lea.vmem %s4333_s7, %s4340_s6 }
  0x24   : > { %v2540_v22 = vadd.s32 4294967169, %v325_v17  ;;  %v2544_v23 = vadd.s32 4294967169, %v429_v18  ;;  %1092 = vperm.xlu0 %3040, %v1010_v15   ;;  %1097 = vperm.xlu1 %3041, %v1011_v16   ;;  %v329_v31 = vor.u32 8388608, %v328_v20 }
  0x25   : > { %v2548_v30 = vadd.s32 4294967169, %v533_v24  ;;  %v433_v32 = vor.u32 8388608, %v432_v25 }
  0x26   : > { %v331_v28 = vadd.s32 1, %v2540_v22  ;;  %v435_v29 = vadd.s32 1, %v2544_v23  ;;  %v3223_v41 = vshll.u32 %v329_v31, 8 }
  0x27   : > { %v539_v37 = vadd.s32 1, %v2548_v30  ;;  %v3225_v42 = vshll.u32 %v433_v32, 8  ;;  %v1020_v30 = vld [vmem:[%s4328_s2 + $0x70] sm:$0xff] }
  0x28   : > { %vm332_vm1 = vcmp.gt.s32.totalorder %v331_v28, 0  ;;  %vm436_vm2 = vcmp.gt.s32.totalorder %v435_v29, 0  ;;  %1102 = vperm.xlu0 %3040, %v1012_v26   ;;  %1107 = vperm.xlu1 %3041, %v1013_v27  }
  0x29   : > { %v333_v35 = vsel %vm332_vm1, %v331_v28, 0  ;;  %v437_v36 = vsel %vm436_vm2, %v435_v29, 0  ;;  %vm540_vm3 = vcmp.gt.s32.totalorder %v539_v37, 0 }
  0x2a   : > { %v335_v39 = vand.u32 31, %v333_v35  ;;  %v334_v40 = vshrl.u32 %v333_v35, 5  ;;  %v3227_v44 = vand.u32 31, %v437_v36  ;;  %v3247_v5 = vsel %vm540_vm3, %v539_v37, 0  ;;  %v1021_v35 = vld [vmem:[%s4328_s2 + $0x78] sm:$0xff] }
  0x2b   : > { %v3262_v22 = vshrl.u32 %v437_v36, 5  ;;  %v3268_v28 = vand.u32 31, %v3247_v5 }
  0x2c   : > { %v336_v43 = vsub.s32 32, %v335_v39  ;;  %v338_v46 = vshll.u32 %v3079_v45, %v335_v39  ;;  %v341_v48 = vshll.u32 %v3080_v47, %v335_v39  ;;  %1112 = vperm.xlu0 %3040, %v1014_v34   ;;  %1117 = vperm.xlu1 %3041, %v1015_v38   ;;  %v344_v50 = vshll.u32 %v3081_v49, %v335_v39 }
  0x2d   : > { %v347_v52 = vshll.u32 %v3082_v51, %v335_v39  ;;  %v350_v54 = vshll.u32 %v3083_v53, %v335_v39  ;;  %vm353_vm4 = vcmp.lt.s32.totalorder %v334_v40, 1  ;;  %vm354_vm5 = vcmp.lt.s32.totalorder %v334_v40, 2 }
  0x2e   : > { %v337_v57 = vshrl.u32 %v3079_v45, %v336_v43  ;;  %v339_v58 = vshrl.u32 %v3080_v47, %v336_v43  ;;  %v342_v59 = vshrl.u32 %v3081_v49, %v336_v43  ;;  %v345_v60 = vshrl.u32 %v3082_v51, %v336_v43 }
  0x2f   : > { %v348_v61 = vshrl.u32 %v3083_v53, %v336_v43  ;;  %v351_v63 = vshrl.u32 %v3084_v62, %v336_v43  ;;  %vm356_vm6 = vcmp.lt.s32.totalorder %v334_v40, 4  ;;  %vm355_vm7 = vcmp.lt.s32.totalorder %v334_v40, 3 }
  0x30   : > { %v340_v0 = vor.u32 %v339_v58, %v338_v46  ;;  %v343_v1 = vor.u32 %v342_v59, %v341_v48  ;;  %v346_v2 = vor.u32 %v345_v60, %v344_v50  ;;  %1122 = vperm.xlu0 %3040, %v1016_v55   ;;  %1127 = vperm.xlu1 %3041, %v1017_v56   ;;  %v440_v17 = vsub.s32 32, %v3227_v44  ;;  %v1022_v55 = vld [vmem:[%s4328_s2 + $0x80] sm:$0xff] }
  0x31   : > { %v349_v3 = vor.u32 %v348_v61, %v347_v52  ;;  %v352_v4 = vor.u32 %v351_v63, %v350_v54  ;;  %v442_v37 = vshll.u32 %v3079_v45, %v3227_v44  ;;  %v445_v39 = vshll.u32 %v3080_v47, %v3227_v44 }
  0x32   : > { %v357_v10 = vsel %vm353_vm4, %v337_v57, %v340_v0  ;;  %v358_v11 = vsel %vm356_vm6, %v346_v2, 2102212464  ;;  %v361_v15 = vsel %vm353_vm4, %v340_v0, %v343_v1  ;;  %v365_v16 = vsel %vm353_vm4, %v343_v1, %v346_v2  ;;  %v1023_v57 = vld [vmem:[%s4328_s2 + $0x88] sm:$0xff] }
  0x33   : > { %v359_v18 = vsel %vm355_vm7, %v343_v1, %v358_v11  ;;  %v362_v19 = vsel %vm356_vm6, %v349_v3, 920167782  ;;  %v366_v20 = vsel %vm356_vm6, %v352_v4, 1326507024  ;;  %v441_v29 = vshrl.u32 %v3079_v45, %v440_v17  ;;  %v1024_v11 = vld [vmem:[%s4328_s2 + $0x90] sm:$0xff] }
  0x34   : > { %v360_v23 = vsel %vm354_vm5, %v357_v10, %v359_v18  ;;  %v363_v24 = vsel %vm355_vm7, %v346_v2, %v362_v19  ;;  %v367_v25 = vsel %vm355_vm7, %v349_v3, %v366_v20  ;;  %1132 = vperm.xlu0 %3040, %v1018_v6   ;;  %1137 = vperm.xlu1 %3041, %v1019_v7   ;;  %vm457_vm8 = vcmp.lt.s32.totalorder %v3262_v22, 1 }
  0x35   : > { %v364_v26 = vsel %vm354_vm5, %v361_v15, %v363_v24  ;;  %v368_v27 = vsel %vm354_vm5, %v365_v16, %v367_v25  ;;  %v376_v36 = vmul.u32 %v3223_v41, %v360_v23  ;;  %v443_v38 = vshrl.u32 %v3080_v47, %v440_v17  ;;  %v1025_v15 = vld [vmem:[%s4328_s2 + $0x98] sm:$0xff] }
  0x36   : > { %v3275_v31 = vmul.u32.u64.low %v3223_v41, %v368_v27  ;;  %v3276_v32 = vmul.u32.u64.high %v3223_v41, %v368_v27, %v3275_v31  ;;  %v3279_v33 = vmul.u32.u64.low %v3223_v41, %v364_v26  ;;  %v3280_v34 = vmul.u32.u64.high %v3223_v41, %v364_v26, %v3279_v33 }
  0x37   : > { %v446_v40 = vshrl.u32 %v3081_v49, %v440_v17  ;;  %v448_v43 = vshll.u32 %v3081_v49, %v3227_v44  ;;  %v449_v46 = vshrl.u32 %v3082_v51, %v440_v17  ;;  %v451_v48 = vshll.u32 %v3082_v51, %v3227_v44 }
  0x38   : > { %1142 = vperm.xlu0 %3040, %v1020_v30   ;;  %1147 = vperm.xlu1 %3041, %v1021_v35   ;;  %v444_v41 = vor.u32 %v443_v38, %v442_v37  ;;  %v452_v50 = vshrl.u32 %v3083_v53, %v440_v17  ;;  %v454_v52 = vshll.u32 %v3083_v53, %v3227_v44  ;;  %v379_v54 = vadd.s32 1, %v3280_v34  ;;  %v1026_v35 = vld [vmem:[%s4328_s2 + $0xa0] sm:$0xff]  ;;  %v1027_v38 = vld [vmem:[%s4328_s2 + $0xa8] sm:$0xff] }
  0x39   : > { %vm378_vm9 = vc.u32 %v3276_v32, %v3279_v33  ;;  %v447_v56 = vor.u32 %v446_v40, %v445_v39  ;;  %vm458_vm10 = vcmp.lt.s32.totalorder %v3262_v22, 2  ;;  %v450_v58 = vor.u32 %v449_v46, %v448_v43 }
  0x3a   : > { %v453_v44 = vor.u32 %v452_v50, %v451_v48  ;;  %v455_v59 = vshrl.u32 %v3084_v62, %v440_v17  ;;  %vm459_vm11 = vcmp.lt.s32.totalorder %v3262_v22, 3  ;;  %v380_v60 = vsel %vm378_vm9, %v379_v54, %v3280_v34  ;;  %v1028_v54 = vld [vmem:[%s4328_s2 + $0xb0] sm:$0xff] }
  0x3b   : > { %vm460_vm12 = vcmp.lt.s32.totalorder %v3262_v22, 4  ;;  %v461_v61 = vsel %vm457_vm8, %v441_v29, %v444_v41  ;;  %v465_v63 = vsel %vm457_vm8, %v444_v41, %v447_v56  ;;  %v381_v0 = vadd.s32 %v380_v60, %v376_v36 }
  0x3c   : > { %1152 = vperm.xlu0 %3040, %v1022_v55   ;;  %v456_v1 = vor.u32 %v455_v59, %v454_v52  ;;  %v462_v2 = vsel %vm460_vm12, %v450_v58, 2102212464  ;;  %v466_v3 = vsel %vm460_vm12, %v453_v44, 920167782  ;;  %1157 = vperm.xlu1 %3041, %v1023_v57   ;;  %v469_v7 = vsel %vm457_vm8, %v447_v56, %v450_v58  ;;  %v1029_v57 = vld [vmem:[%s4328_s2 + $0xb8] sm:$0xff] }
  0x3d   : > { %v463_v4 = vsel %vm459_vm11, %v447_v56, %v462_v2  ;;  %v467_v6 = vsel %vm459_vm11, %v450_v58, %v466_v3  ;;  %v529_v10 = vand.u32 2147483647, %v3190_v13  ;;  %v382_v16 = vadd.s32 536870912, %v381_v0  ;;  %v1031_v2 = vld [vmem:[%s4328_s2 + $0xc8] sm:$0xff] }
  0x3e   : > { %v544_v17 = vsub.s32 32, %v3268_v28  ;;  %v468_v18 = vsel %vm458_vm10, %v465_v63, %v467_v6  ;;  %v470_v19 = vsel %vm460_vm12, %v456_v1, 1326507024  ;;  %v464_v20 = vsel %vm458_vm10, %v461_v61, %v463_v4  ;;  %v1030_v63 = vld [vmem:[%s4328_s2 + $0xc0] sm:$0xff] }
  0x3f   : > { %v471_v23 = vsel %vm459_vm11, %v453_v44, %v470_v19  ;;  %v3347_v24 = vmul.u32.u64.low %v3225_v42, %v468_v18  ;;  %v3348_v25 = vmul.u32.u64.high %v3225_v42, %v468_v18, %v3347_v24  ;;  %v3351_v26 = vshrl.u32 %v382_v16, 30 }
  0x40   : > { %v472_v27 = vsel %vm458_vm10, %v469_v7, %v471_v23  ;;  %1162 = vperm.xlu0 %3040, %v1024_v11   ;;  %1167 = vperm.xlu1 %3041, %v1025_v15   ;;  %v3356_v29 = vshrl.u32 %v3247_v5, 5  ;;  %v536_v34 = vand.u32 8388607, %v529_v10  ;;  %v480_v22 = vmul.u32 %v3225_v42, %v464_v20  ;;  %v1032_v20 = vld [vmem:[%s4328_s2 + $0xd0] sm:$0xff] }
  0x41   : > { %v3359_v30 = vmul.u32.u64.low %v3225_v42, %v472_v27  ;;  %v3360_v31 = vmul.u32.u64.high %v3225_v42, %v472_v27, %v3359_v30  ;;  %v384_v36 = vshll.u32 %v3351_v26, 30  ;;  %v546_v37 = vshll.u32 %v3079_v45, %v3268_v28 }
  0x42   : > { %v547_v5 = vshrl.u32 %v3080_v47, %v544_v17  ;;  %v483_v39 = vadd.s32 1, %v3348_v25  ;;  %v549_v40 = vshll.u32 %v3080_v47, %v3268_v28  ;;  %v550_v43 = vshrl.u32 %v3081_v49, %v544_v17  ;;  %v1033_v30 = vld [vmem:[%s4328_s2 + $0xd8] sm:$0xff] }
  0x43   : > { %v555_v46 = vshll.u32 %v3082_v51, %v3268_v28  ;;  %v3381_v42 = vsub.s32 %v381_v0, %v384_v36  ;;  %v552_v48 = vshll.u32 %v3081_v49, %v3268_v28  ;;  %v553_v41 = vshrl.u32 %v3082_v51, %v544_v17 }
  0x44   : > { %v556_v50 = vshrl.u32 %v3083_v53, %v544_v17  ;;  %1172 = vperm.xlu0 %3040, %v1026_v35   ;;  %vm482_vm13 = vc.u32 %v3360_v31, %v3347_v24  ;;  %v537_v52 = vor.u32 8388608, %v536_v34  ;;  %v558_v47 = vshll.u32 %v3083_v53, %v3268_v28  ;;  %1177 = vperm.xlu1 %3041, %v1027_v38  }
  0x45   : > { %v387_v55 = vsub.s32 0, %v3381_v42  ;;  %v484_v49 = vsel %vm482_vm13, %v483_v39, %v3348_v25  ;;  %v545_v51 = vshrl.u32 %v3079_v45, %v544_v17  ;;  %v548_v56 = vor.u32 %v547_v5, %v546_v37 }
  0x46   : > { %v485_v58 = vadd.s32 %v484_v49, %v480_v22  ;;  %v551_v44 = vor.u32 %v550_v43, %v549_v40  ;;  %v557_v59 = vor.u32 %v556_v50, %v555_v46  ;;  %v559_v53 = vshrl.u32 %v3084_v62, %v544_v17  ;;  %v1034_v46 = vld [vmem:[%s4328_s2 + $0xe0] sm:$0xff]  ;;  %v1036_v49 = vld [vmem:[%s4328_s2 + $0xf0] sm:$0xff] }
  0x47   : > { %v2541_v28 = vmin.u32 %v387_v55, %v3381_v42  ;;  %v554_v60 = vor.u32 %v553_v41, %v552_v48  ;;  %vm561_vm14 = vcmp.lt.s32.totalorder %v3356_v29, 1  ;;  %vm564_vm15 = vcmp.lt.s32.totalorder %v3356_v29, 4 }
  0x48   : > { %1182 = vperm.xlu0 %3040, %v1028_v54   ;;  %v486_v61 = vadd.s32 536870912, %v485_v58  ;;  %v560_v45 = vor.u32 %v559_v53, %v558_v47  ;;  %vm563_vm1 = vcmp.lt.s32.totalorder %v3356_v29, 3  ;;  %1187 = vperm.xlu1 %3041, %v1029_v57   ;;  %vm562_vm2 = vcmp.lt.s32.totalorder %v3356_v29, 2  ;;  %v1037_v57 = vld [vmem:[%s4328_s2 + $0xf8] sm:$0xff] }
  0x49   : > { %v389_v0 = vclz %v2541_v28  ;;  %v566_v62 = vsel %vm564_vm15, %v554_v60, 2102212464  ;;  %v577_v1 = vshll.u32 %v537_v52, 8  ;;  %v377_v3 = vadd.s32 %v3279_v33, %v3276_v32 }
  0x4a   : > { %v3416_v4 = vshrl.u32 %v486_v61, 30  ;;  %v569_v6 = vsel %vm561_vm14, %v548_v56, %v551_v44  ;;  %v570_v7 = vsel %vm564_vm15, %v557_v59, 920167782  ;;  %v565_v15 = vsel %vm561_vm14, %v545_v51, %v548_v56  ;;  %v1054_v61 = vld [vmem:[%s4328_s2 + $0x180] sm:$0xff] }
  0x4b   : > { %v2542_v11 = vadd.s32 4294967294, %v389_v0  ;;  %v571_v16 = vsel %vm563_vm1, %v554_v60, %v570_v7  ;;  %v573_v17 = vsel %vm561_vm14, %v551_v44, %v554_v60  ;;  %v567_v33 = vsel %vm563_vm1, %v551_v44, %v566_v62  ;;  %v1055_v62 = vld [vmem:[%s4328_s2 + $0x188] sm:$0xff] }
  0x4c   : > { %1192 = vperm.xlu0 %3040, %v1030_v63   ;;  %v488_v32 = vshll.u32 %v3416_v4, 30  ;;  %v572_v18 = vsel %vm562_vm2, %v569_v6, %v571_v16  ;;  %v574_v19 = vsel %vm564_vm15, %v560_v45, 1326507024  ;;  %1197 = vperm.xlu1 %3041, %v1031_v2   ;;  %v568_v39 = vsel %vm562_vm2, %v565_v15, %v567_v33  ;;  %v1038_v15 = vld [vmem:[%s4328_s2 + $0x100] sm:$0xff] }
  0x4d   : > { %vm2543_vm3 = vcmp.lt.s32.totalorder %v2542_v11, 0  ;;  %v575_v23 = vsel %vm563_vm1, %v557_v59, %v574_v19  ;;  %v3440_v25 = vmul.u32.u64.low %v577_v1, %v572_v18  ;;  %v3441_v27 = vmul.u32.u64.high %v577_v1, %v572_v18, %v3440_v25 }
  0x4e   : > { %v392_v34 = vsel %vm2543_vm3, 0, %v2542_v11  ;;  %v489_v35 = vsub.s32 %v485_v58, %v488_v32  ;;  %v576_v36 = vsel %vm562_vm2, %v573_v17, %v575_v23  ;;  %v584_v54 = vmul.u32 %v577_v1, %v568_v39 }
  0x4f   : > { %v393_v22 = vsub.s32 32, %v392_v34  ;;  %v394_v37 = vshll.u32 %v3381_v42, %v392_v34  ;;  %v397_v5 = vsub.s32 4294967266, %v392_v34  ;;  %v1035_v42 = vld [vmem:[%s4328_s2 + $0xe8] sm:$0xff]  ;;  %v587_v52 = vadd.s32 1, %v3441_v27 }
  0x50   : > { %1202 = vperm.xlu0 %3040, %v1032_v20   ;;  %v491_v38 = vsub.s32 0, %v489_v35  ;;  %v3452_v40 = vmul.u32.u64.low %v577_v1, %v576_v36  ;;  %v3453_v43 = vmul.u32.u64.high %v577_v1, %v576_v36, %v3452_v40  ;;  %1207 = vperm.xlu1 %3041, %v1033_v30   ;;  %v407_v53 = vsub.s32 4, %v3351_v26 }
  0x51   : > { %v395_v48 = vshrl.u32 %v377_v3, %v393_v22  ;;  %v398_v41 = vadd.s32 127, %v397_v5  ;;  %v481_v60 = vadd.s32 %v3347_v24, %v3360_v31  ;;  %vm323_vm6 = vcmp.lt.s32.totalorder %v3180_v8, 0  ;;  %v1040_v5 = vld [vmem:[%s4328_s2 + $0x110] sm:$0xff]  ;;  %v1041_v40 = vld [vmem:[%s4328_s2 + $0x118] sm:$0xff] }
  0x52   : > { %v2545_v50 = vmin.u32 %v491_v38, %v489_v35  ;;  %vm586_vm4 = vc.u32 %v3453_v43, %v3440_v25  ;;  %vm322_vm7 = vcmp.le.f32.partialorder %v321_v14, 0.7853982  ;;  %v408_v31 = vsel %vm323_vm6, %v407_v53, %v3351_v26  ;;  %v1039_v14 = vld [vmem:[%s4328_s2 + $0x108] sm:$0xff] }
  0x53   : > { %v396_v47 = vor.u32 %v395_v48, %v394_v37  ;;  %v399_v29 = vshll.u32 %v398_v41, 23  ;;  %v588_v44 = vsel %vm586_vm4, %v587_v52, %v3441_v27  ;;  %v3494_v26 = vsel %vm322_vm7, 0, %v408_v31  ;;  %v1056_v27 = vld [vmem:[%s4328_s2 + $0x190] sm:$0xff]  ;;  %v1058_v41 = vld [vmem:[%s4328_s2 + $0x1a0] sm:$0xff]  ;;  %v1059_v52 = vld [vmem:[%s4328_s2 + $0x1a8] sm:$0xff] }
  0x54   : > { %1212 = vperm.xlu0 %3040, %v1034_v46   ;;  %v493_v55 = vclz %v2545_v50  ;;  %1217 = vperm.xlu1 %3041, %v1035_v42   ;;  %v589_v28 = vadd.s32 %v588_v44, %v584_v54  ;;  %v414_v30 = vadd.s32 3, %v3494_v26  ;;  %vm427_vm9 = vcmp.lt.s32.totalorder %v3182_v9, 0 }
  0x55   : > { %v400_v51 = vor.u32 4788187, %v399_v29  ;;  %v403_v56 = vcvt.s32.f32 %v396_v47  ;;  %v585_v50 = vadd.s32 %v3440_v25, %v3453_v43  ;;  %vm413_vm11 = vweird.f32 %v3180_v8 }
  0x56   : > { %v2546_v58 = vadd.s32 4294967294, %v493_v55  ;;  %v590_v0 = vadd.s32 536870912, %v589_v28  ;;  %v415_v38 = vand.u32 3, %v414_v30  ;;  %vm3530_vm14 = vcmp.le.f32.partialorder %v425_v21, 0.7853982  ;;  %v1043_v21 = vld [vmem:[%s4328_s2 + $0x128] sm:$0xff] }
  0x57   : > { %v401_v59 = vand.u32 2147483647, %v400_v51  ;;  %vm531_vm15 = vcmp.lt.s32.totalorder %v3190_v13, 0  ;;  %vm530_vm1 = vcmp.le.f32.partialorder %v529_v10, 0.7853982  ;;  %v726_v10 = vand.u32 3, %v3494_v26 }
  0x58   : > { %1222 = vperm.xlu0 %3040, %v1036_v49   ;;  %vm2547_vm5 = vcmp.lt.s32.totalorder %v2546_v58, 0  ;;  %1227 = vperm.xlu1 %3041, %v1037_v57   ;;  %v3484_v6 = vshrl.u32 %v590_v0, 30  ;;  %vm420_vm8 = vcmp.eq.s32.totalorder %v415_v38, 2  ;;  %vm417_vm12 = vcmp.eq.s32.totalorder %v415_v38, 0  ;;  %v1064_v26 = vld [vmem:[%s4328_s2 + $0x1d0] sm:$0xff] }
  0x59   : > { %v404_v45 = vmul.f32 %v403_v56, %v401_v59  ;;  %v496_v63 = vsel %vm2547_vm5, 0, %v2546_v58  ;;  %vm416_vm13 = vcmp.lt.s32.totalorder %v415_v38, 2  ;;  %v1042_v58 = vld [vmem:[%s4328_s2 + $0x120] sm:$0xff]  ;;  %vm728_vm2 = vcmp.eq.s32.totalorder %v726_v10, 0 }
  0x5a   : > { %v497_v1 = vsub.s32 32, %v496_v63  ;;  %v498_v2 = vshll.u32 %v489_v35, %v496_v63  ;;  %v501_v3 = vsub.s32 4294967266, %v496_v63  ;;  %v592_v17 = vshll.u32 %v3484_v6, 30  ;;  %v1057_v35 = vld [vmem:[%s4328_s2 + $0x198] sm:$0xff] }
  0x5b   : > { %v405_v24 = vxor.u32 2147483648, %v404_v45  ;;  %vm731_vm3 = vcmp.eq.s32.totalorder %v726_v10, 2 }
  0x5c   : > { %1312 = vperm.xlu0 %3040, %v1054_v61   ;;  %v499_v7 = vshrl.u32 %v481_v60, %v497_v1  ;;  %v502_v11 = vadd.s32 127, %v501_v3  ;;  %1317 = vperm.xlu1 %3041, %v1055_v62   ;;  %v593_v19 = vsub.s32 %v589_v28, %v592_v17  ;;  %v511_v61 = vsub.s32 4, %v3416_v4  ;;  %v1060_v1 = vld [vmem:[%s4328_s2 + $0x1b0] sm:$0xff] }
  0x5d   : > { %v406_v16 = vsel %vm323_vm6, %v405_v24, %v404_v45 }
  0x5e   : > { %v409_v32 = vsel %vm322_vm7, %v3180_v8, %v406_v16  ;;  %v500_v33 = vor.u32 %v499_v7, %v498_v2  ;;  %v503_v18 = vshll.u32 %v502_v11, 23  ;;  %v595_v34 = vsub.s32 0, %v593_v19  ;;  %v1061_v2 = vld [vmem:[%s4328_s2 + $0x1b8] sm:$0xff] }
  0x5f   : > { %3042 = vcosq.f32 %v409_v32  ;;  %v512_v31 = vsel %vm427_vm9, %v511_v61, %v3416_v4  ;;  %v615_v11 = vsub.s32 4, %v3484_v6  ;;  %v1045_v16 = vld [vmem:[%s4328_s2 + $0x138] sm:$0xff] }
  0x60   : > { %1232 = vperm.xlu0 %3040, %v1038_v15   ;;  %3044 = vsinq.f32 %v409_v32  ;;  %v504_v20 = vor.u32 4788187, %v503_v18  ;;  %v507_v23 = vcvt.s32.f32 %v500_v33  ;;  %1237 = vperm.xlu1 %3041, %v1039_v14   ;;  %v2549_v22 = vmin.u32 %v595_v34, %v593_v19  ;;  %v1044_v15 = vld [vmem:[%s4328_s2 + $0x130] sm:$0xff]  ;;  %v1062_v33 = vld [vmem:[%s4328_s2 + $0x1c0] sm:$0xff] }
  0x61   : > { %v514_v17 = vsel %vm3530_vm14, 0, %v512_v31  ;;  %v616_v32 = vsel %vm531_vm15, %v615_v11, %v3484_v6  ;;  %v1046_v6 = vld [vmem:[%s4328_s2 + $0x140] sm:$0xff]  ;;  %v1069_v31 = vld [vmem:[%s4328_s2 + $0x1f8] sm:$0xff]  ;;  %v1052_v11 = vld [vmem:[%s4328_s2 + $0x170] sm:$0xff] }
  0x62   : > { %v505_v36 = vand.u32 2147483647, %v504_v20  ;;  %v597_v39 = vclz %v2549_v22  ;;  %v518_v18 = vadd.s32 3, %v514_v17  ;;  %v1047_v22 = vld [vmem:[%s4328_s2 + $0x148] sm:$0xff] }
  0x64   : > { %1322 = vperm.xlu0 %3040, %v1056_v27   ;;  %v508_v37 = vmul.f32 %v507_v23, %v505_v36  ;;  %1327 = vperm.xlu1 %3041, %v1057_v35   ;;  %v2550_v46 = vadd.s32 4294967294, %v597_v39  ;;  %v618_v27 = vsel %vm530_vm1, 0, %v616_v32  ;;  %v519_v35 = vand.u32 3, %v518_v18  ;;  %v1065_v39 = vld [vmem:[%s4328_s2 + $0x1d8] sm:$0xff]  ;;  %v948_v32 = vld [vmem:[%s4327_s1 + $0x30] sm:$0xff]  ;;  %v950_v18 = vld [vmem:[%s4327_s1 + $0x40] sm:$0xff] }
  0x65   : > { %v829_v36 = vand.u32 3, %v514_v17  ;;  %v945_v17 = vld [vmem:[%s4327_s1 + $0x18] sm:$0xff] }
  0x66   : > { %v509_v48 = vxor.u32 2147483648, %v508_v37  ;;  %vm2551_vm10 = vcmp.lt.s32.totalorder %v2550_v46, 0  ;;  %vm521_vm4 = vcmp.eq.s32.totalorder %v519_v35, 0  ;;  %vm524_vm5 = vcmp.eq.s32.totalorder %v519_v35, 2 }
  0x67   : > { %v600_v54 = vsel %vm2551_vm10, 0, %v2550_v46  ;;  %vm831_vm6 = vcmp.eq.s32.totalorder %v829_v36, 0  ;;  %vm834_vm7 = vcmp.eq.s32.totalorder %v829_v36, 2  ;;  %vm830_vm10 = vcmp.lt.s32.totalorder %v829_v36, 2  ;;  %v960_v36 = vld [vmem:[%s4327_s1 + $0x90] sm:$0xff] }
  0x68   : > { %1242 = vperm.xlu0 %3040, %v1040_v5   ;;  %1247 = vperm.xlu1 %3041, %v1041_v40   ;;  %v601_v49 = vsub.s32 32, %v600_v54  ;;  %v602_v51 = vshll.u32 %v593_v19, %v600_v54  ;;  %v510_v56 = vsel %vm427_vm9, %v509_v48, %v508_v37  ;;  %v605_v57 = vsub.s32 4294967266, %v600_v54  ;;  %v1063_v19 = vld [vmem:[%s4328_s2 + $0x1c8] sm:$0xff] }
  0x69   : > { %v3512_v42 = vpop.eup %3042  ;;  %v513_v45 = vsel %vm3530_vm14, %v3182_v9, %v510_v56  ;;  %v622_v37 = vadd.s32 3, %v618_v27  ;;  %vm727_vm9 = vcmp.lt.s32.totalorder %v726_v10, 2  ;;  %v956_v10 = vld [vmem:[%s4327_s1 + $0x70] sm:$0xff] }
  0x6a   : > { %v3520_v47 = vpop.eup %3044  ;;  %v421_v29 = vxor.u32 2147483648, %v3512_v42  ;;  %v603_v59 = vshrl.u32 %v585_v50, %v601_v49  ;;  %v606_v28 = vadd.s32 127, %v605_v57  ;;  %3046 = vcosq.f32 %v513_v45  ;;  %v1048_v49 = vld [vmem:[%s4328_s2 + $0x150] sm:$0xff] }
  0x6b   : > { %v418_v55 = vxor.u32 2147483648, %v3520_v47  ;;  %3048 = vsinq.f32 %v513_v45  ;;  %v623_v40 = vand.u32 3, %v622_v37  ;;  %v962_v37 = vld [vmem:[%s4327_s1 + $0xa0] sm:$0xff] }
  0x6c   : > { %1332 = vperm.xlu0 %3040, %v1058_v41   ;;  %v422_v25 = vsel %vm420_vm8, %v421_v29, %v3520_v47  ;;  %1337 = vperm.xlu1 %3041, %v1059_v52   ;;  %v604_v63 = vor.u32 %v603_v59, %v602_v51  ;;  %v607_v62 = vshll.u32 %v606_v28, 23  ;;  %vm520_vm8 = vcmp.lt.s32.totalorder %v519_v35, 2  ;;  %v1067_v59 = vld [vmem:[%s4328_s2 + $0x1e8] sm:$0xff] }
  0x6d   : > { %v419_v44 = vsel %vm417_vm12, %v3512_v42, %v418_v55  ;;  %v730_v46 = vsel %vm728_vm2, %v3512_v42, %v418_v55  ;;  %v733_v48 = vsel %vm731_vm3, %v421_v29, %v3520_v47  ;;  %v932_v51 = vand.u32 3, %v618_v27  ;;  %v1049_v55 = vld [vmem:[%s4328_s2 + $0x158] sm:$0xff]  ;;  %v954_v27 = vld [vmem:[%s4327_s1 + $0x60] sm:$0xff]  ;;  %v959_v35 = vld [vmem:[%s4327_s1 + $0x88] sm:$0xff] }
  0x6e   : > { %v423_v53 = vsel %vm416_vm13, %v419_v44, %v422_v25  ;;  %v608_v3 = vor.u32 4788187, %v607_v62  ;;  %v611_v24 = vcvt.s32.f32 %v604_v63  ;;  %vm517_vm12 = vweird.f32 %v3182_v9  ;;  %v1051_v9 = vld [vmem:[%s4328_s2 + $0x168] sm:$0xff] }
  0x6f   : > { %v424_v60 = vsel %vm413_vm11, nan, %v423_v53  ;;  %vm625_vm13 = vcmp.eq.s32.totalorder %v623_v40, 0  ;;  %vm628_vm14 = vcmp.eq.s32.totalorder %v623_v40, 2  ;;  %v734_v43 = vsel %vm727_vm9, %v730_v46, %v733_v48  ;;  %v968_v46 = vld [vmem:[%s4327_s1 + $0xd0] sm:$0xff]  ;;  %v969_v48 = vld [vmem:[%s4327_s1 + $0xd8] sm:$0xff] }
  0x70   : > { %1252 = vperm.xlu0 %3040, %v1042_v58   ;;  %v3552_v0 = vpack.c.bf16 %v424_v60, %v3190_v13  ;;  %1257 = vperm.xlu1 %3041, %v1043_v21   ;;  %v609_v7 = vand.u32 2147483647, %v608_v3  ;;  %v1066_v58 = vld [vmem:[%s4328_s2 + $0x1e0] sm:$0xff]  ;;  %vm934_vm2 = vcmp.eq.s32.totalorder %v932_v51, 0  ;;  %vm937_vm3 = vcmp.eq.s32.totalorder %v932_v51, 2 }
  0x71   : > { %v735_v28 = vsel %vm413_vm11, nan, %v734_v43  ;;  %v981_v43 = vld [vmem:[%s4327_s1 + $0x138] sm:$0xff]  ;;  %vm3087_vm11 = vmmov 0  }
  0x72   : > { %2889 = vmatprep.subr.bf16.mxu0 %v3552_v0  ;;  %v612_v14 = vmul.f32 %v611_v24, %v609_v7  ;;  %v1068_v24 = vld [vmem:[%s4328_s2 + $0x1f0] sm:$0xff] }
  0x73   : > { %2891 = vmatpush3.bf16.msra.mxu0 %v3552_v0 }
  0x74   : > { %1342 = vperm.xlu0 %3040, %v1060_v1   ;;  %1347 = vperm.xlu1 %3041, %v1061_v2   ;;  %v613_v4 = vxor.u32 2147483648, %v612_v14  ;;  %v3047_v30 = vpop.eup %3046  ;;  %v1050_v1 = vld [vmem:[%s4328_s2 + $0x160] sm:$0xff] }
  0x75   : > { %v3049_v34 = vpop.eup %3048  ;;  %v525_v38 = vxor.u32 2147483648, %v3047_v30 }
  0x76   : > { %v614_v20 = vsel %vm531_vm15, %v613_v4, %v612_v14  ;;  %v522_v5 = vxor.u32 2147483648, %v3049_v34  ;;  %vm624_vm15 = vcmp.lt.s32.totalorder %v623_v40, 2  ;;  %v946_v14 = vld [vmem:[%s4327_s1 + $0x20] sm:$0xff]  ;;  %v947_v4 = vld [vmem:[%s4327_s1 + $0x28] sm:$0xff] }
  0x77   : > { %v617_v23 = vsel %vm530_vm1, %v3190_v13, %v614_v20  ;;  %v526_v50 = vsel %vm524_vm5, %v525_v38, %v3049_v34  ;;  %v836_v54 = vsel %vm834_vm7, %v525_v38, %v3049_v34  ;;  %vm621_vm1 = vweird.f32 %v3190_v13  ;;  %v943_v13 = vld [vmem:[%s4327_s1 + $0x8] sm:$0xff]  ;;  %v952_v20 = vld [vmem:[%s4327_s1 + $0x50] sm:$0xff]  ;;  %v958_v34 = vld [vmem:[%s4327_s1 + $0x80] sm:$0xff] }
  0x78   : > { %1262 = vperm.xlu0 %3040, %v1044_v15   ;;  %1267 = vperm.xlu1 %3041, %v1045_v16   ;;  %3050 = vcosq.f32 %v617_v23  ;;  %v523_v41 = vsel %vm521_vm4, %v3047_v30, %v522_v5  ;;  %v833_v52 = vsel %vm831_vm6, %v3047_v30, %v522_v5  ;;  %vm933_vm4 = vcmp.lt.s32.totalorder %v932_v51, 2  ;;  %v1053_v15 = vld [vmem:[%s4328_s2 + $0x178] sm:$0xff]  ;;  %v944_v16 = vld [vmem:[%s4327_s1 + $0x10] sm:$0xff]  ;;  %v955_v30 = vld [vmem:[%s4327_s1 + $0x68] sm:$0xff] }
  0x79   : > { %3052 = vsinq.f32 %v617_v23  ;;  %v527_v47 = vsel %vm520_vm8, %v523_v41, %v526_v50  ;;  %v837_v56 = vsel %vm830_vm10, %v833_v52, %v836_v54  ;;  %v953_v23 = vld [vmem:[%s4327_s1 + $0x58] sm:$0xff]  ;;  %v963_v5 = vld [vmem:[%s4327_s1 + $0xa8] sm:$0xff]  ;;  %v964_v38 = vld [vmem:[%s4327_s1 + $0xb0] sm:$0xff] }
  0x7a   : > { %v528_v21 = vsel %vm517_vm12, nan, %v527_v47  ;;  %v838_v60 = vsel %vm517_vm12, nan, %v837_v56  ;;  %v967_v40 = vld [vmem:[%s4327_s1 + $0xc8] sm:$0xff]  ;;  %v970_v41 = vld [vmem:[%s4327_s1 + $0xe0] sm:$0xff]  ;;  %v972_v52 = vld [vmem:[%s4327_s1 + $0xf0] sm:$0xff] }
  0x7b   : > { %v3635_v8 = vpack.c.bf16 %v838_v60, %v735_v28  ;;  %v971_v50 = vld [vmem:[%s4327_s1 + $0xe8] sm:$0xff]  ;;  %v973_v54 = vld [vmem:[%s4327_s1 + $0xf8] sm:$0xff]  ;;  %v982_v56 = vld [vmem:[%s4327_s1 + $0x140] sm:$0xff] }
  0x7c   : > { %1352 = vperm.xlu0 %3040, %v1062_v33   ;;  %1357 = vperm.xlu1 %3041, %v1063_v19   ;;  %v949_v33 = vld [vmem:[%s4327_s1 + $0x38] sm:$0xff]  ;;  %v951_v19 = vld [vmem:[%s4327_s1 + $0x48] sm:$0xff]  ;;  %v990_v60 = vld [vmem:[%s4327_s1 + $0x180] sm:$0xff] }
  0x7d   : > { %v975_v51 = vld [vmem:[%s4327_s1 + $0x108] sm:$0xff]  ;;  %v989_v28 = vld [vmem:[%s4327_s1 + $0x178] sm:$0xff] }
  0x7e   : > { %v979_v47 = vld [vmem:[%s4327_s1 + $0x128] sm:$0xff] }
  0x80   : > { %1272 = vperm.xlu0 %3040, %v1046_v6   ;;  %1277 = vperm.xlu1 %3041, %v1047_v22   ;;  %v957_v6 = vld [vmem:[%s4327_s1 + $0x78] sm:$0xff] }
  0x81   : > { %v961_v22 = vld [vmem:[%s4327_s1 + $0x98] sm:$0xff] }
  0x82   : > { %v3051_v25 = vpop.eup %3050 }
  0x83   : > { %v3053_v42 = vpop.eup %3052  ;;  %v629_v29 = vxor.u32 2147483648, %v3051_v25 }
  0x84   : > { %1362 = vperm.xlu0 %3040, %v1064_v26   ;;  %1367 = vperm.xlu1 %3041, %v1065_v39   ;;  %v626_v57 = vxor.u32 2147483648, %v3053_v42  ;;  %v965_v26 = vld [vmem:[%s4327_s1 + $0xb8] sm:$0xff]  ;;  %v966_v39 = vld [vmem:[%s4327_s1 + $0xc0] sm:$0xff] }
  0x85   : > { %v630_v44 = vsel %vm628_vm14, %v629_v29, %v3053_v42  ;;  %v939_v62 = vsel %vm937_vm3, %v629_v29, %v3053_v42  ;;  %v978_v42 = vld [vmem:[%s4327_s1 + $0x120] sm:$0xff]  ;;  %v980_v29 = vld [vmem:[%s4327_s1 + $0x130] sm:$0xff] }
  0x86   : > { %v627_v53 = vsel %vm625_vm13, %v3051_v25, %v626_v57  ;;  %v936_v63 = vsel %vm934_vm2, %v3051_v25, %v626_v57  ;;  %v977_v25 = vld [vmem:[%s4327_s1 + $0x118] sm:$0xff]  ;;  %v983_v57 = vld [vmem:[%s4327_s1 + $0x148] sm:$0xff] }
  0x87   : > { %v631_v61 = vsel %vm624_vm15, %v627_v53, %v630_v44  ;;  %v940_v3 = vsel %vm933_vm4, %v936_v63, %v939_v62  ;;  %v985_v44 = vld [vmem:[%s4327_s1 + $0x158] sm:$0xff]  ;;  %v988_v53 = vld [vmem:[%s4327_s1 + $0x170] sm:$0xff]  ;;  %v994_v62 = vld [vmem:[%s4327_s1 + $0x1a0] sm:$0xff] }
  0x88   : > { %1282 = vperm.xlu0 %3040, %v1048_v49   ;;  %1287 = vperm.xlu1 %3041, %v1049_v55   ;;  %v632_v45 = vsel %vm621_vm1, nan, %v631_v61  ;;  %v3651_v7 = vsel %vm621_vm1, nan, %v940_v3  ;;  %v974_v49 = vld [vmem:[%s4327_s1 + $0x100] sm:$0xff]  ;;  %v976_v55 = vld [vmem:[%s4327_s1 + $0x110] sm:$0xff]  ;;  %v3085_v61 = vmov 0.0|0.0  }
  0x89   : > { %v3633_v2 = vpack.c.bf16 %v632_v45, %v528_v21  ;;  %v987_v21 = vld [vmem:[%s4327_s1 + $0x168] sm:$0xff]  ;;  %2900 = vmatprep.subr.bf16.mxu1 %v3085_v61  ;;  %v992_v63 = vld [vmem:[%s4327_s1 + $0x190] sm:$0xff] }
  0x8a   : > { %v991_v45 = vld [vmem:[%s4327_s1 + $0x188] sm:$0xff]  ;;  %v1000_v3 = vld [vmem:[%s4327_s1 + $0x1d0] sm:$0xff] }
  0x8b   : > { %2893 = vmatprep.subr.bf16.mxu0 %v3633_v2 }
  0x8c   : > { %1372 = vperm.xlu0 %3040, %v1066_v58   ;;  %1377 = vperm.xlu1 %3041, %v1067_v59   ;;  %v984_v58 = vld [vmem:[%s4327_s1 + $0x150] sm:$0xff]  ;;  %v986_v59 = vld [vmem:[%s4327_s1 + $0x160] sm:$0xff] }
  0x8d   : > { %2895 = vmatpush3.bf16.msra.mxu0 %v3633_v2 }
  0x8e   : > { %2897 = vmatprep.subr.bf16.mxu0 %v3635_v8 }
  0x90   : > { %1292 = vperm.xlu0 %3040, %v1050_v1   ;;  %1297 = vperm.xlu1 %3041, %v1051_v9   ;;  %v996_v1 = vld [vmem:[%s4327_s1 + $0x1b0] sm:$0xff]  ;;  %v998_v9 = vld [vmem:[%s4327_s1 + $0x1c0] sm:$0xff] }
  0x91   : > { %2899 = vmatpush3.bf16.msra.mxu0 %v3635_v8 }
  0x92   : > { %2765 = vmatprep.subr.mxu0 %v3651_v7 }
  0x94   : > { %1382 = vperm.xlu0 %3040, %v1068_v24   ;;  %1387 = vperm.xlu1 %3041, %v1069_v31   ;;  %v1001_v24 = vld [vmem:[%s4327_s1 + $0x1d8] sm:$0xff]  ;;  %v1002_v31 = vld [vmem:[%s4327_s1 + $0x1e0] sm:$0xff] }
  0x95   : > { %2766 = vmatpush3.msra.mxu0 %v3651_v7 }
  0x96   : > { %2768 = vmatmul.mubr.msk.f32.vlgmr.msra.gmra.mrb[0].mxu0 %vm1390_vm0, %v943_v13  ;;  %2948 = vmatprep.subr.bf16.mxu0 %v3085_v61  ;;  %v1005_v13 = vld [vmem:[%s4327_s1 + $0x1f8] sm:$0xff] }
  0x97   : > { %2770 = vmatprep.mubr.msk.f32.mxu0 %vm1390_vm0, %v944_v16  ;;  %2950 = vmatpush3.bf16.msra.mxu0 %v3188_v12  ;;  %v993_v12 = vld [vmem:[%s4327_s1 + $0x198] sm:$0xff]  ;;  %v2001_v16 = vld [vmem:[%s4329_s3 + $0x8] sm:$0xff] }
  0x98   : > { %1302 = vperm.xlu0 %3040, %v1052_v11   ;;  %1307 = vperm.xlu1 %3041, %v1053_v15   ;;  %v1003_v11 = vld [vmem:[%s4327_s1 + $0x1e8] sm:$0xff]  ;;  %v1004_v15 = vld [vmem:[%s4327_s1 + $0x1f0] sm:$0xff] }
  0x99   : > { %2951 = vmatprep.subr.bf16.mxu0 %v3085_v61  ;;  %2128 = vmatprep.mubr.f32.mxu1 %v2001_v16 }
  0x9a   : > { %2771 = vmatmul.mubr.msk.f32.gmra.mrb[2].mxu0 %vm1390_vm0, %v945_v17 }
  0x9b   : > { %2773 = vmatprep.mubr.msk.f32.mxu0 %vm1390_vm0, %v946_v14  ;;  %2953 = vmatpush3.bf16.msra.mxu0 %v3552_v0  ;;  %v995_v0 = vld [vmem:[%s4327_s1 + $0x1a8] sm:$0xff]  ;;  %v1083_v17 = vpop.permute.xlu1 %1082  ;;  %v1073_v14 = vpop.permute.xlu0 %1072 }
  0x9c   : > { %2954 = vmatprep.subr.bf16.mxu0 %v3085_v61 }
  0x9e   : > { %2774 = vmatmul.mubr.msk.f32.gmra.mrb[4].mxu0 %vm1390_vm0, %v947_v4 }
  0x9f   : > { %2776 = vmatprep.mubr.msk.f32.mxu0 %vm1390_vm0, %v948_v32  ;;  %2956 = vmatpush3.bf16.msra.mxu0 %v3633_v2  ;;  %v997_v2 = vld [vmem:[%s4327_s1 + $0x1b8] sm:$0xff]  ;;  %v1088_v4 = vpop.permute.xlu1 %1087  ;;  %v1078_v32 = vpop.permute.xlu0 %1077 }
  0xa0   : > { %2957 = vmatprep.subr.bf16.mxu0 %v3085_v61 }
  0xa2   : > { %2777 = vmatmul.mubr.msk.f32.gmra.mrb[6].mxu0 %vm1390_vm0, %v949_v33 }
  0xa3   : > { %2779 = vmatprep.mubr.msk.f32.mxu0 %vm1390_vm0, %v950_v18  ;;  %2959 = vmatpush3.bf16.msra.mxu0 %v3635_v8  ;;  %v999_v8 = vld [vmem:[%s4327_s1 + $0x1c8] sm:$0xff]  ;;  %v1098_v33 = vpop.permute.xlu1 %1097  ;;  %v1093_v18 = vpop.permute.xlu0 %1092 }
  0xa6   : > { %2780 = vmatmul.mubr.msk.f32.gmra.mrb[8].mxu0 %vm1390_vm0, %v951_v19 }
  0xa7   : > { %2782 = vmatprep.mubr.msk.f32.mxu0 %vm1390_vm0, %v952_v20  ;;  %v1108_v19 = vpop.permute.xlu1 %1107  ;;  %v1103_v20 = vpop.permute.xlu0 %1102 }
  0xaa   : > { %2783 = vmatmul.mubr.msk.f32.gmra.mrb[10].mxu0 %vm1390_vm0, %v953_v23 }
  0xab   : > { %2785 = vmatprep.mubr.msk.f32.mxu0 %vm1390_vm0, %v954_v27  ;;  %v1118_v23 = vpop.permute.xlu1 %1117  ;;  %v1113_v27 = vpop.permute.xlu0 %1112 }
  0xae   : > { %2786 = vmatmul.mubr.msk.f32.gmra.mrb[12].mxu0 %vm1390_vm0, %v955_v30 }
  0xaf   : > { %2788 = vmatprep.mubr.msk.f32.mxu0 %vm1390_vm0, %v956_v10  ;;  %v1128_v30 = vpop.permute.xlu1 %1127 }
  0xb2   : > { %2789 = vmatmul.mubr.msk.f32.gmra.mrb[14].mxu0 %vm1390_vm0, %v957_v6  ;;  %v1123_v6 = vpop.permute.xlu0 %1122 }
  0xb3   : > { %2791 = vmatprep.mubr.msk.f32.mxu0 %vm1390_vm0, %v958_v34 }
  0xb6   : > { %2792 = vmatmul.mubr.msk.f32.gmra.mrb[16].mxu0 %vm1390_vm0, %v959_v35 }
  0xb7   : > { %2794 = vmatprep.mubr.msk.f32.mxu0 %vm1390_vm0, %v960_v36 }
  0xba   : > { %2795 = vmatmul.mubr.msk.f32.gmra.mrb[18].mxu0 %vm1390_vm0, %v961_v22 }
  0xbb   : > { %2797 = vmatprep.mubr.msk.f32.mxu0 %vm1390_vm0, %v962_v37 }
  0xbe   : > { %2798 = vmatmul.mubr.msk.f32.gmra.mrb[20].mxu0 %vm1390_vm0, %v963_v5 }
  0xbf   : > { %2800 = vmatprep.mubr.msk.f32.mxu0 %vm1390_vm0, %v964_v38 }
  0xc2   : > { %2801 = vmatmul.mubr.msk.f32.gmra.mrb[22].mxu0 %vm1390_vm0, %v965_v26 }
  0xc3   : > { %2803 = vmatprep.mubr.msk.f32.mxu0 %vm1390_vm0, %v966_v39  ;;  %v1138_v39 = vpop.permute.xlu1 %1137 }
  0xc6   : > { %2804 = vmatmul.mubr.msk.f32.gmra.mrb[24].mxu0 %vm1390_vm0, %v967_v40 }
  0xc7   : > { %2806 = vmatprep.mubr.msk.f32.mxu0 %vm1390_vm0, %v968_v46 }
  0xca   : > { %2807 = vmatmul.mubr.msk.f32.gmra.mrb[26].mxu0 %vm1390_vm0, %v969_v48  ;;  %v1133_v48 = vpop.permute.xlu0 %1132 }
  0xcb   : > { %2809 = vmatprep.mubr.msk.f32.mxu0 %vm1390_vm0, %v970_v41 }
  0xce   : > { %2810 = vmatmul.mubr.msk.f32.gmra.mrb[28].mxu0 %vm1390_vm0, %v971_v50 }
  0xcf   : > { %2812 = vmatprep.mubr.msk.f32.mxu0 %vm1390_vm0, %v972_v52 }
  0xd2   : > { %2813 = vmatmul.mubr.msk.f32.gmra.mrb[30].mxu0 %vm1390_vm0, %v973_v54 }
  0xd3   : > { %2815 = vmatprep.mubr.msk.f32.mxu0 %vm1390_vm0, %v974_v49 }
  0xd6   : > { %2816 = vmatmul.mubr.msk.f32.gmra.mrb[32].mxu0 %vm1390_vm0, %v975_v51 }
  0xd7   : > { %2818 = vmatprep.mubr.msk.f32.mxu0 %vm1390_vm0, %v976_v55 }
  0xda   : > { %2819 = vmatmul.mubr.msk.f32.gmra.mrb[34].mxu0 %vm1390_vm0, %v977_v25 }
  0xdb   : > { %2821 = vmatprep.mubr.msk.f32.mxu0 %vm1390_vm0, %v978_v42  ;;  %v1148_v42 = vpop.permute.xlu1 %1147 }
  0xde   : > { %2822 = vmatmul.mubr.msk.f32.gmra.mrb[36].mxu0 %vm1390_vm0, %v979_v47 }
  0xdf   : > { %2824 = vmatprep.mubr.msk.f32.mxu0 %vm1390_vm0, %v980_v29 }
  0xe2   : > { %2825 = vmatmul.mubr.msk.f32.gmra.mrb[38].mxu0 %vm1390_vm0, %v981_v43  ;;  %v1143_v43 = vpop.permute.xlu0 %1142 }
  0xe3   : > { %2827 = vmatprep.mubr.msk.f32.mxu0 %vm1390_vm0, %v982_v56 }
  0xe6   : > { %2828 = vmatmul.mubr.msk.f32.gmra.mrb[40].mxu0 %vm1390_vm0, %v983_v57 }
  0xe7   : > { %2830 = vmatprep.mubr.msk.f32.mxu0 %vm1390_vm0, %v984_v58 }
  0xea   : > { %2831 = vmatmul.mubr.msk.f32.gmra.mrb[42].mxu0 %vm1390_vm0, %v985_v44 }
  0xeb   : > { %2833 = vmatprep.mubr.msk.f32.mxu0 %vm1390_vm0, %v986_v59 }
  0xee   : > { %2834 = vmatmul.mubr.msk.f32.gmra.mrb[44].mxu0 %vm1390_vm0, %v987_v21 }
  0xef   : > { %2836 = vmatprep.mubr.msk.f32.mxu0 %vm1390_vm0, %v988_v53 }
  0xf2   : > { %2837 = vmatmul.mubr.msk.f32.gmra.mrb[46].mxu0 %vm1390_vm0, %v989_v28 }
  0xf3   : > { %2839 = vmatprep.mubr.msk.f32.mxu0 %vm1390_vm0, %v990_v60 }
  0xf6   : > { %2840 = vmatmul.mubr.msk.f32.gmra.mrb[48].mxu0 %vm1390_vm0, %v991_v45  ;;  %v1158_v45 = vpop.permute.xlu1 %1157 }
  0xf7   : > { %2842 = vmatprep.mubr.msk.f32.mxu0 %vm1390_vm0, %v992_v63 }
  0xfa   : > { %2843 = vmatmul.mubr.msk.f32.gmra.mrb[50].mxu0 %vm1390_vm0, %v993_v12 }
  0xfb   : > { %2845 = vmatprep.mubr.msk.f32.mxu0 %vm1390_vm0, %v994_v62  ;;  %v1153_v62 = vpop.permute.xlu0 %1152 }
  0xfe   : > { %2846 = vmatmul.mubr.msk.f32.gmra.mrb[52].mxu0 %vm1390_vm0, %v995_v0 }
  0xff   : > { %2848 = vmatprep.mubr.msk.f32.mxu0 %vm1390_vm0, %v996_v1  ;;  %v1163_v16 = vpop.permute.xlu0 %1162 }
 0x102   : > { %2849 = vmatmul.mubr.msk.f32.gmra.mrb[54].mxu0 %vm1390_vm0, %v997_v2 }
 0x103   : > { %2851 = vmatprep.mubr.msk.f32.mxu0 %vm1390_vm0, %v998_v9 }
 0x106   : > { %2852 = vmatmul.mubr.msk.f32.gmra.mrb[56].mxu0 %vm1390_vm0, %v999_v8 }
 0x107   : > { %2854 = vmatprep.mubr.msk.f32.mxu0 %vm1390_vm0, %v1000_v3 }
 0x10a   : > { %2855 = vmatmul.mubr.msk.f32.gmra.mrb[58].mxu0 %vm1390_vm0, %v1001_v24 }
 0x10b   : > { %2857 = vmatprep.mubr.msk.f32.mxu0 %vm1390_vm0, %v1002_v31 }
 0x10e   : > { %2858 = vmatmul.mubr.msk.f32.gmra.mrb[60].mxu0 %vm1390_vm0, %v1003_v11  ;;  %v1168_v11 = vpop.permute.xlu1 %1167 }
 0x10f   : > { %2860 = vmatprep.mubr.msk.f32.mxu0 %vm1390_vm0, %v1004_v15 }
 0x112   : > { %2861 = vmatmul.mubr.msk.f32.gmra.mrb[62].mxu0 %vm1390_vm0, %v1005_v13 }
 0x169   : > { %v2769_v10 = vpop.f32.mrb[0].mxu0 }
 0x16a   : > { %v1655_v34 = vadd.f32 %v2769_v10, %v1078_v32  ;;  %v1649_v35 = vpop.f32.mrb[1].mxu0 }
 0x16b   : > { %v1650_v36 = vadd.f32 %v1649_v35, %v1073_v14 }
 0x16c   : > { %v1969_v22 = vmax.f32 %v1655_v34, 0.0 }
 0x16d   : > { %v1968_v37 = vmax.f32 %v1650_v36, 0.0  ;;  %v2772_v5 = vpop.f32.mrb[2].mxu0 }
 0x16e   : > { %v1665_v38 = vadd.f32 %v2772_v5, %v1088_v4  ;;  %v1659_v26 = vpop.f32.mrb[3].mxu0 }
 0x16f   : > { %v1660_v40 = vadd.f32 %v1659_v26, %v1083_v17  ;;  %v2901_v46 = vpack.c.bf16 %v1969_v22, %v1968_v37 }
 0x170   : > { %v1971_v41 = vmax.f32 %v1665_v38, 0.0 }
 0x171   : > { %v1970_v50 = vmax.f32 %v1660_v40, 0.0  ;;  %v2775_v52 = vpop.f32.mrb[4].mxu0  ;;  %2902 = vmatpush1.bf16.msra.mxu1 %v2901_v46 }
 0x172   : > { %v1675_v54 = vadd.f32 %v2775_v52, %v1098_v33  ;;  %v1669_v49 = vpop.f32.mrb[5].mxu0  ;;  %2903 = vmatprep.subr.bf16.mxu1 %v3085_v61 }
 0x173   : > { %v2904_v51 = vpack.c.bf16 %v1971_v41, %v1970_v50  ;;  %v1670_v55 = vadd.f32 %v1669_v49, %v1093_v18 }
 0x174   : > { %v1973_v25 = vmax.f32 %v1675_v54, 0.0 }
 0x175   : > { %v1972_v47 = vmax.f32 %v1670_v55, 0.0  ;;  %v2778_v29 = vpop.f32.mrb[6].mxu0  ;;  %2905 = vmatpush1.bf16.msra.mxu1 %v2904_v51 }
 0x176   : > { %v1685_v56 = vadd.f32 %v2778_v29, %v1108_v19  ;;  %v1679_v57 = vpop.f32.mrb[7].mxu0  ;;  %2906 = vmatprep.subr.bf16.mxu1 %v3085_v61 }
 0x177   : > { %v2907_v58 = vpack.c.bf16 %v1973_v25, %v1972_v47  ;;  %v1680_v44 = vadd.f32 %v1679_v57, %v1103_v20 }
 0x178   : > { %v1975_v59 = vmax.f32 %v1685_v56, 0.0 }
 0x179   : > { %v1974_v21 = vmax.f32 %v1680_v44, 0.0  ;;  %v2781_v53 = vpop.f32.mrb[8].mxu0  ;;  %2908 = vmatpush1.bf16.msra.mxu1 %v2907_v58 }
 0x17a   : > { %v1695_v28 = vadd.f32 %v2781_v53, %v1118_v23  ;;  %v1689_v60 = vpop.f32.mrb[9].mxu0  ;;  %2909 = vmatprep.subr.bf16.mxu1 %v3085_v61 }
 0x17b   : > { %v2910_v63 = vpack.c.bf16 %v1975_v59, %v1974_v21  ;;  %v1690_v12 = vadd.f32 %v1689_v60, %v1113_v27  ;;  %v1178_v27 = vpop.permute.xlu1 %1177 }
 0x17c   : > { %v1977_v0 = vmax.f32 %v1695_v28, 0.0 }
 0x17d   : > { %v1976_v1 = vmax.f32 %v1690_v12, 0.0  ;;  %v2784_v2 = vpop.f32.mrb[10].mxu0  ;;  %2911 = vmatpush1.bf16.msra.mxu1 %v2910_v63 }
 0x17e   : > { %v1705_v9 = vadd.f32 %v2784_v2, %v1128_v30  ;;  %v1699_v8 = vpop.f32.mrb[11].mxu0  ;;  %2912 = vmatprep.subr.bf16.mxu1 %v3085_v61 }
 0x17f   : > { %v2913_v3 = vpack.c.bf16 %v1977_v0, %v1976_v1  ;;  %v1700_v24 = vadd.f32 %v1699_v8, %v1123_v6  ;;  %v1173_v6 = vpop.permute.xlu0 %1172 }
 0x180   : > { %v1979_v31 = vmax.f32 %v1705_v9, 0.0 }
 0x181   : > { %v1978_v15 = vmax.f32 %v1700_v24, 0.0  ;;  %v2787_v13 = vpop.f32.mrb[12].mxu0  ;;  %2914 = vmatpush1.bf16.msra.mxu1 %v2913_v3 }
 0x182   : > { %v1715_v17 = vadd.f32 %v2787_v13, %v1138_v39  ;;  %v1709_v14 = vpop.f32.mrb[13].mxu0  ;;  %2915 = vmatprep.subr.bf16.mxu1 %v3085_v61  ;;  %v1188_v39 = vpop.permute.xlu1 %1187 }
 0x183   : > { %v2916_v4 = vpack.c.bf16 %v1979_v31, %v1978_v15  ;;  %v1710_v32 = vadd.f32 %v1709_v14, %v1133_v48  ;;  %v1183_v48 = vpop.permute.xlu0 %1182 }
 0x184   : > { %v1981_v33 = vmax.f32 %v1715_v17, 0.0 }
 0x185   : > { %v1980_v18 = vmax.f32 %v1710_v32, 0.0  ;;  %v2790_v19 = vpop.f32.mrb[14].mxu0  ;;  %2917 = vmatpush1.bf16.msra.mxu1 %v2916_v4 }
 0x186   : > { %v1725_v20 = vadd.f32 %v2790_v19, %v1148_v42  ;;  %v1719_v23 = vpop.f32.mrb[15].mxu0  ;;  %2918 = vmatprep.subr.bf16.mxu1 %v3085_v61  ;;  %v1198_v47 = vpop.permute.xlu1 %1197 }
 0x187   : > { %v2919_v30 = vpack.c.bf16 %v1981_v33, %v1980_v18  ;;  %v1720_v10 = vadd.f32 %v1719_v23, %v1143_v43  ;;  %v1193_v56 = vpop.permute.xlu0 %1192 }
 0x188   : > { %v1983_v34 = vmax.f32 %v1725_v20, 0.0 }
 0x189   : > { %v1982_v35 = vmax.f32 %v1720_v10, 0.0  ;;  %v2793_v36 = vpop.f32.mrb[16].mxu0  ;;  %2920 = vmatpush1.bf16.msra.mxu1 %v2919_v30 }
 0x18a   : > { %v1735_v22 = vadd.f32 %v2793_v36, %v1158_v45  ;;  %v1729_v37 = vpop.f32.mrb[17].mxu0  ;;  %2921 = vmatprep.subr.bf16.mxu1 %v3085_v61  ;;  %v1208_v45 = vpop.permute.xlu1 %1207 }
 0x18b   : > { %v2922_v5 = vpack.c.bf16 %v1983_v34, %v1982_v35  ;;  %v1730_v38 = vadd.f32 %v1729_v37, %v1153_v62  ;;  %v1203_v62 = vpop.permute.xlu0 %1202 }
 0x18c   : > { %v1985_v26 = vmax.f32 %v1735_v22, 0.0 }
 0x18d   : > { %v1984_v40 = vmax.f32 %v1730_v38, 0.0  ;;  %v2796_v46 = vpop.f32.mrb[18].mxu0  ;;  %2923 = vmatpush1.bf16.msra.mxu1 %v2922_v5 }
 0x18e   : > { %v1745_v41 = vadd.f32 %v2796_v46, %v1168_v11  ;;  %v1739_v50 = vpop.f32.mrb[19].mxu0  ;;  %2924 = vmatprep.subr.bf16.mxu1 %v3085_v61  ;;  %v1218_v15 = vpop.permute.xlu1 %1217  ;;  %v2000_v46 = vld [vmem:[%s4329_s3] sm:$0xff] }
 0x18f   : > { %v2925_v52 = vpack.c.bf16 %v1985_v26, %v1984_v40  ;;  %v1740_v54 = vadd.f32 %v1739_v50, %v1163_v16  ;;  %v1213_v17 = vpop.permute.xlu0 %1212 }
 0x190   : > { %v1987_v49 = vmax.f32 %v1745_v41, 0.0  ;;  %v2003_v41 = vld [vmem:[%s4329_s3 + $0x18] sm:$0xff] }
 0x191   : > { %v1986_v51 = vmax.f32 %v1740_v54, 0.0  ;;  %v2799_v55 = vpop.f32.mrb[20].mxu0  ;;  %2926 = vmatpush1.bf16.msra.mxu1 %v2925_v52  ;;  %v2005_v54 = vld [vmem:[%s4329_s3 + $0x28] sm:$0xff] }
 0x192   : > { %v1755_v25 = vadd.f32 %v2799_v55, %v1178_v27  ;;  %v1749_v42 = vpop.f32.mrb[21].mxu0  ;;  %2927 = vmatprep.subr.bf16.mxu1 %v3085_v61  ;;  %v1228_v27 = vpop.permute.xlu1 %1227 }
 0x193   : > { %v2928_v29 = vpack.c.bf16 %v1987_v49, %v1986_v51  ;;  %v1750_v43 = vadd.f32 %v1749_v42, %v1173_v6  ;;  %v1223_v6 = vpop.permute.xlu0 %1222  ;;  %v2004_v51 = vld [vmem:[%s4329_s3 + $0x20] sm:$0xff] }
 0x194   : > { %v1989_v57 = vmax.f32 %v1755_v25, 0.0  ;;  %v2007_v25 = vld [vmem:[%s4329_s3 + $0x38] sm:$0xff] }
 0x195   : > { %v1988_v58 = vmax.f32 %v1750_v43, 0.0  ;;  %v2802_v44 = vpop.f32.mrb[22].mxu0  ;;  %2929 = vmatpush1.bf16.msra.mxu1 %v2928_v29  ;;  %v2009_v43 = vld [vmem:[%s4329_s3 + $0x48] sm:$0xff] }
 0x196   : > { %v1765_v59 = vadd.f32 %v2802_v44, %v1188_v39  ;;  %v1759_v21 = vpop.f32.mrb[23].mxu0  ;;  %2930 = vmatprep.subr.bf16.mxu1 %v3085_v61  ;;  %v2011_v44 = vld [vmem:[%s4329_s3 + $0x58] sm:$0xff] }
 0x197   : > { %v2931_v53 = vpack.c.bf16 %v1989_v57, %v1988_v58  ;;  %v1760_v28 = vadd.f32 %v1759_v21, %v1183_v48  ;;  %v2008_v57 = vld [vmem:[%s4329_s3 + $0x40] sm:$0xff]  ;;  %v2010_v21 = vld [vmem:[%s4329_s3 + $0x50] sm:$0xff] }
 0x198   : > { %v1991_v60 = vmax.f32 %v1765_v59, 0.0 }
 0x199   : > { %v1990_v63 = vmax.f32 %v1760_v28, 0.0  ;;  %v2805_v12 = vpop.f32.mrb[24].mxu0  ;;  %2932 = vmatpush1.bf16.msra.mxu1 %v2931_v53  ;;  %v2013_v28 = vld [vmem:[%s4329_s3 + $0x68] sm:$0xff] }
 0x19a   : > { %v1775_v0 = vadd.f32 %v2805_v12, %v1198_v47  ;;  %v1769_v1 = vpop.f32.mrb[25].mxu0  ;;  %2933 = vmatprep.subr.bf16.mxu1 %v3085_v61  ;;  %v2006_v47 = vld [vmem:[%s4329_s3 + $0x30] sm:$0xff]  ;;  %v2015_v12 = vld [vmem:[%s4329_s3 + $0x78] sm:$0xff] }
 0x19b   : > { %v2934_v2 = vpack.c.bf16 %v1991_v60, %v1990_v63  ;;  %v1770_v9 = vadd.f32 %v1769_v1, %v1193_v56 }
 0x19c   : > { %v1993_v8 = vmax.f32 %v1775_v0, 0.0  ;;  %v2014_v0 = vld [vmem:[%s4329_s3 + $0x70] sm:$0xff] }
 0x19d   : > { %v1992_v3 = vmax.f32 %v1770_v9, 0.0  ;;  %v2808_v24 = vpop.f32.mrb[26].mxu0  ;;  %2935 = vmatpush1.bf16.msra.mxu1 %v2934_v2  ;;  %v2017_v2 = vld [vmem:[%s4329_s3 + $0x88] sm:$0xff] }
 0x19e   : > { %v1785_v31 = vadd.f32 %v2808_v24, %v1208_v45  ;;  %v1779_v11 = vpop.f32.mrb[27].mxu0  ;;  %2936 = vmatprep.subr.bf16.mxu1 %v3085_v61  ;;  %v2012_v45 = vld [vmem:[%s4329_s3 + $0x60] sm:$0xff]  ;;  %v2019_v24 = vld [vmem:[%s4329_s3 + $0x98] sm:$0xff] }
 0x19f   : > { %v2937_v13 = vpack.c.bf16 %v1993_v8, %v1992_v3  ;;  %v1780_v16 = vadd.f32 %v1779_v11, %v1203_v62  ;;  %v2016_v8 = vld [vmem:[%s4329_s3 + $0x80] sm:$0xff]  ;;  %v2018_v11 = vld [vmem:[%s4329_s3 + $0x90] sm:$0xff] }
 0x1a0   : > { %v1995_v14 = vmax.f32 %v1785_v31, 0.0 }
 0x1a1   : > { %v1994_v4 = vmax.f32 %v1780_v16, 0.0  ;;  %v2811_v32 = vpop.f32.mrb[28].mxu0  ;;  %2938 = vmatpush1.bf16.msra.mxu1 %v2937_v13  ;;  %v2021_v13 = vld [vmem:[%s4329_s3 + $0xa8] sm:$0xff] }
 0x1a2   : > { %v1795_v33 = vadd.f32 %v2811_v32, %v1218_v15  ;;  %v1789_v18 = vpop.f32.mrb[29].mxu0  ;;  %2939 = vmatprep.subr.bf16.mxu1 %v3085_v61 }
 0x1a3   : > { %v2940_v19 = vpack.c.bf16 %v1995_v14, %v1994_v4  ;;  %v1790_v20 = vadd.f32 %v1789_v18, %v1213_v17  ;;  %v2020_v17 = vld [vmem:[%s4329_s3 + $0xa0] sm:$0xff]  ;;  %v2023_v4 = vld [vmem:[%s4329_s3 + $0xb8] sm:$0xff] }
 0x1a4   : > { %v1997_v23 = vmax.f32 %v1795_v33, 0.0  ;;  %v2022_v33 = vld [vmem:[%s4329_s3 + $0xb0] sm:$0xff] }
 0x1a5   : > { %v1996_v30 = vmax.f32 %v1790_v20, 0.0  ;;  %v2814_v10 = vpop.f32.mrb[30].mxu0  ;;  %2941 = vmatpush1.bf16.msra.mxu1 %v2940_v19  ;;  %v2025_v19 = vld [vmem:[%s4329_s3 + $0xc8] sm:$0xff] }
 0x1a6   : > { %v1805_v34 = vadd.f32 %v2814_v10, %v1228_v27  ;;  %v1799_v35 = vpop.f32.mrb[31].mxu0  ;;  %2942 = vmatprep.subr.bf16.mxu1 %v3085_v61 }
 0x1a7   : > { %v2943_v36 = vpack.c.bf16 %v1997_v23, %v1996_v30  ;;  %v1800_v22 = vadd.f32 %v1799_v35, %v1223_v6  ;;  %v2024_v23 = vld [vmem:[%s4329_s3 + $0xc0] sm:$0xff]  ;;  %v2027_v30 = vld [vmem:[%s4329_s3 + $0xd8] sm:$0xff]  ;;  %v2026_v6 = vld [vmem:[%s4329_s3 + $0xd0] sm:$0xff] }
 0x1a8   : > { %v1999_v37 = vmax.f32 %v1805_v34, 0.0  ;;  %v2029_v35 = vld [vmem:[%s4329_s3 + $0xe8] sm:$0xff] }
 0x1a9   : > { %v1998_v5 = vmax.f32 %v1800_v22, 0.0  ;;  %v3940_v38 = vpop.f32.mrb[32].mxu0  ;;  %2944 = vmatpush1.bf16.msra.mxu1 %v2943_v36  ;;  %v2028_v22 = vld [vmem:[%s4329_s3 + $0xe0] sm:$0xff] }
 0x1aa   : > { %v3942_v26 = vpop.f32.mrb[33].mxu0  ;;  %2945 = vmatprep.subr.bf16.mxu1 %v3085_v61  ;;  %v2002_v61 = vld [vmem:[%s4329_s3 + $0x10] sm:$0xff] }
 0x1ab   : > { %v2946_v39 = vpack.c.bf16 %v1999_v37, %v1998_v5  ;;  %v2031_v5 = vld [vmem:[%s4329_s3 + $0xf8] sm:$0xff] }
 0x1ad   : > { %v3945_v40 = vpop.f32.mrb[34].mxu0  ;;  %2947 = vmatpush1.bf16.msra.mxu1 %v2946_v39  ;;  %v2030_v39 = vld [vmem:[%s4329_s3 + $0xf0] sm:$0xff] }
 0x1ae   : > { %v3950_v48 = vpop.f32.mrb[35].mxu0 }
 0x1b0   : > { %2129 = vmatmul.mubr.f32.vlgmr.msra.gmra.mrb[0].mxu1 %v2000_v46  ;;  %v2033_v46 = vld [vmem:[%s4329_s3 + $0x108] sm:$0xff] }
 0x1b1   : > { %v3955_v50 = vpop.f32.mrb[36].mxu0  ;;  %2133 = vmatprep.mubr.f32.mxu1 %v2003_v41  ;;  %v2032_v41 = vld [vmem:[%s4329_s3 + $0x100] sm:$0xff] }
 0x1b2   : > { %v3960_v52 = vpop.f32.mrb[37].mxu0 }
 0x1b4   : > { %2134 = vmatmul.mubr.f32.gmra.mrb[2].mxu1 %v2002_v61  ;;  %v2035_v61 = vld [vmem:[%s4329_s3 + $0x118] sm:$0xff] }
 0x1b5   : > { %v3965_v49 = vpop.f32.mrb[38].mxu0  ;;  %2138 = vmatprep.mubr.f32.mxu1 %v2005_v54  ;;  %v2034_v54 = vld [vmem:[%s4329_s3 + $0x110] sm:$0xff] }
 0x1b6   : > { %v3970_v55 = vpop.f32.mrb[39].mxu0 }
 0x1b8   : > { %2139 = vmatmul.mubr.f32.gmra.mrb[4].mxu1 %v2004_v51  ;;  %v2037_v51 = vld [vmem:[%s4329_s3 + $0x128] sm:$0xff] }
 0x1b9   : > { %v3975_v42 = vpop.f32.mrb[40].mxu0  ;;  %2143 = vmatprep.mubr.f32.mxu1 %v2007_v25  ;;  %v2036_v25 = vld [vmem:[%s4329_s3 + $0x120] sm:$0xff] }
 0x1ba   : > { %v3980_v29 = vpop.f32.mrb[41].mxu0 }
 0x1bc   : > { %2144 = vmatmul.mubr.f32.gmra.mrb[6].mxu1 %v2006_v47  ;;  %v2039_v47 = vld [vmem:[%s4329_s3 + $0x138] sm:$0xff] }
 0x1bd   : > { %v3985_v56 = vpop.f32.mrb[42].mxu0  ;;  %2148 = vmatprep.mubr.f32.mxu1 %v2009_v43  ;;  %v2038_v43 = vld [vmem:[%s4329_s3 + $0x130] sm:$0xff] }
 0x1be   : > { %v3990_v58 = vpop.f32.mrb[43].mxu0 }
 0x1c0   : > { %2149 = vmatmul.mubr.f32.gmra.mrb[8].mxu1 %v2008_v57  ;;  %v2041_v57 = vld [vmem:[%s4329_s3 + $0x148] sm:$0xff] }
 0x1c1   : > { %v3995_v59 = vpop.f32.mrb[44].mxu0  ;;  %2153 = vmatprep.mubr.f32.mxu1 %v2011_v44  ;;  %v2040_v44 = vld [vmem:[%s4329_s3 + $0x140] sm:$0xff] }
 0x1c2   : > { %v4000_v53 = vpop.f32.mrb[45].mxu0 }
 0x1c4   : > { %2154 = vmatmul.mubr.f32.gmra.mrb[10].mxu1 %v2010_v21  ;;  %v2043_v21 = vld [vmem:[%s4329_s3 + $0x158] sm:$0xff] }
 0x1c5   : > { %v4005_v60 = vpop.f32.mrb[46].mxu0  ;;  %2158 = vmatprep.mubr.f32.mxu1 %v2013_v28  ;;  %v2042_v28 = vld [vmem:[%s4329_s3 + $0x150] sm:$0xff] }
 0x1c6   : > { %v4010_v63 = vpop.f32.mrb[47].mxu0 }
 0x1c8   : > { %2159 = vmatmul.mubr.f32.gmra.mrb[12].mxu1 %v2012_v45  ;;  %v2045_v45 = vld [vmem:[%s4329_s3 + $0x168] sm:$0xff] }
 0x1c9   : > { %v4015_v62 = vpop.f32.mrb[48].mxu0  ;;  %2163 = vmatprep.mubr.f32.mxu1 %v2015_v12  ;;  %v2044_v12 = vld [vmem:[%s4329_s3 + $0x160] sm:$0xff] }
 0x1ca   : > { %v4020_v1 = vpop.f32.mrb[49].mxu0 }
 0x1cc   : > { %2164 = vmatmul.mubr.f32.gmra.mrb[14].mxu1 %v2014_v0  ;;  %v2047_v0 = vld [vmem:[%s4329_s3 + $0x178] sm:$0xff] }
 0x1cd   : > { %v4025_v9 = vpop.f32.mrb[50].mxu0  ;;  %2168 = vmatprep.mubr.f32.mxu1 %v2017_v2  ;;  %v2046_v2 = vld [vmem:[%s4329_s3 + $0x170] sm:$0xff] }
 0x1ce   : > { %v4030_v3 = vpop.f32.mrb[51].mxu0 }
 0x1d0   : > { %2169 = vmatmul.mubr.f32.gmra.mrb[16].mxu1 %v2016_v8  ;;  %v2049_v8 = vld [vmem:[%s4329_s3 + $0x188] sm:$0xff] }
 0x1d1   : > { %v4035_v31 = vpop.f32.mrb[52].mxu0  ;;  %2173 = vmatprep.mubr.f32.mxu1 %v2019_v24  ;;  %v2048_v24 = vld [vmem:[%s4329_s3 + $0x180] sm:$0xff] }
 0x1d2   : > { %v4040_v15 = vpop.f32.mrb[53].mxu0 }
 0x1d4   : > { %2174 = vmatmul.mubr.f32.gmra.mrb[18].mxu1 %v2018_v11  ;;  %v2051_v11 = vld [vmem:[%s4329_s3 + $0x198] sm:$0xff] }
 0x1d5   : > { %v4045_v16 = vpop.f32.mrb[54].mxu0  ;;  %2178 = vmatprep.mubr.f32.mxu1 %v2021_v13  ;;  %v2050_v13 = vld [vmem:[%s4329_s3 + $0x190] sm:$0xff] }
 0x1d6   : > { %v4050_v14 = vpop.f32.mrb[55].mxu0 }
 0x1d8   : > { %2179 = vmatmul.mubr.f32.gmra.mrb[20].mxu1 %v2020_v17  ;;  %v2053_v17 = vld [vmem:[%s4329_s3 + $0x1a8] sm:$0xff] }
 0x1d9   : > { %v4055_v32 = vpop.f32.mrb[56].mxu0  ;;  %2183 = vmatprep.mubr.f32.mxu1 %v2023_v4  ;;  %v2052_v4 = vld [vmem:[%s4329_s3 + $0x1a0] sm:$0xff] }
 0x1da   : > { %v4060_v18 = vpop.f32.mrb[57].mxu0 }
 0x1dc   : > { %2184 = vmatmul.mubr.f32.gmra.mrb[22].mxu1 %v2022_v33  ;;  %v2055_v33 = vld [vmem:[%s4329_s3 + $0x1b8] sm:$0xff] }
 0x1dd   : > { %v4065_v20 = vpop.f32.mrb[58].mxu0  ;;  %2188 = vmatprep.mubr.f32.mxu1 %v2025_v19  ;;  %v2054_v19 = vld [vmem:[%s4329_s3 + $0x1b0] sm:$0xff] }
 0x1de   : > { %v4070_v27 = vpop.f32.mrb[59].mxu0 }
 0x1e0   : > { %2189 = vmatmul.mubr.f32.gmra.mrb[24].mxu1 %v2024_v23  ;;  %v2057_v23 = vld [vmem:[%s4329_s3 + $0x1c8] sm:$0xff] }
 0x1e1   : > { %v4075_v10 = vpop.f32.mrb[60].mxu0  ;;  %2193 = vmatprep.mubr.f32.mxu1 %v2027_v30  ;;  %v2056_v30 = vld [vmem:[%s4329_s3 + $0x1c0] sm:$0xff] }
 0x1e2   : > { %v4080_v34 = vpop.f32.mrb[61].mxu0 }
 0x1e4   : > { %2194 = vmatmul.mubr.f32.gmra.mrb[26].mxu1 %v2026_v6  ;;  %v2059_v6 = vld [vmem:[%s4329_s3 + $0x1d8] sm:$0xff] }
 0x1e5   : > { %v4085_v36 = vpop.f32.mrb[62].mxu0  ;;  %2198 = vmatprep.mubr.f32.mxu1 %v2029_v35  ;;  %v2058_v35 = vld [vmem:[%s4329_s3 + $0x1d0] sm:$0xff] }
 0x1e6   : > { %v4090_v37 = vpop.f32.mrb[63].mxu0 }
 0x1e8   : > { %2199 = vmatmul.mubr.f32.gmra.mrb[28].mxu1 %v2028_v22  ;;  %v2061_v22 = vld [vmem:[%s4329_s3 + $0x1e8] sm:$0xff] }
 0x1e9   : > { %2203 = vmatprep.mubr.f32.mxu1 %v2031_v5  ;;  %v2060_v5 = vld [vmem:[%s4329_s3 + $0x1e0] sm:$0xff] }
 0x1ec   : > { %2204 = vmatmul.mubr.f32.gmra.mrb[30].mxu1 %v2030_v39  ;;  %v2063_v39 = vld [vmem:[%s4329_s3 + $0x1f8] sm:$0xff] }
 0x1ed   : > { %2208 = vmatprep.mubr.f32.mxu1 %v2033_v46  ;;  %v2062_v46 = vld [vmem:[%s4329_s3 + $0x1f0] sm:$0xff] }
 0x1f0   : > { %2209 = vmatmul.mubr.f32.gmra.mrb[32].mxu1 %v2032_v41  ;;  %v3086_v41 = vmov 0.0  }
 0x1f1   : > { %2213 = vmatprep.mubr.f32.mxu1 %v2035_v61  ;;  %2879 = vmatprep.subr.mxu0 %v3086_v41  ;;  %v2322_v61 = vld [vmem:[%s4331_s5] sm:$0x1] }
 0x1f2   : > { %2880 = vmatpush3.msra.mxu0 %v3651_v7  ;;  %2881 = vmatprep.mubr.msk.f32.mxu0 %vm3087_vm11, %v3086_v41 }
 0x1f3   : > { %2882 = vmatmul.mubr.msk.f32.vlgmr.msra.gmra.mrb[64].mxu0 %vm1390_vm0, %v2322_v61 }
 0x1f4   : > { %2214 = vmatmul.mubr.f32.gmra.mrb[34].mxu1 %v2034_v54  ;;  %v4199_v54 = vpop.permute.xlu0 %1312 }
 0x1f5   : > { %2218 = vmatprep.mubr.f32.mxu1 %v2037_v51  ;;  %v4201_v51 = vpop.permute.xlu1 %1317 }
 0x1f8   : > { %2219 = vmatmul.mubr.f32.gmra.mrb[36].mxu1 %v2036_v25  ;;  %v1233_v25 = vpop.permute.xlu0 %1232 }
 0x1f9   : > { %2223 = vmatprep.mubr.f32.mxu1 %v2039_v47  ;;  %v1238_v47 = vpop.permute.xlu1 %1237 }
 0x1fc   : > { %2224 = vmatmul.mubr.f32.gmra.mrb[38].mxu1 %v2038_v43  ;;  %v4203_v43 = vpop.permute.xlu0 %1322 }
 0x1fd   : > { %2228 = vmatprep.mubr.f32.mxu1 %v2041_v57  ;;  %v4205_v57 = vpop.permute.xlu1 %1327 }
 0x200   : > { %2229 = vmatmul.mubr.f32.gmra.mrb[40].mxu1 %v2040_v44  ;;  %v1243_v44 = vpop.permute.xlu0 %1242 }
 0x201   : > { %2233 = vmatprep.mubr.f32.mxu1 %v2043_v21  ;;  %v1248_v7 = vpop.permute.xlu1 %1247 }
 0x204   : > { %2234 = vmatmul.mubr.f32.gmra.mrb[42].mxu1 %v2042_v28  ;;  %v4207_v21 = vpop.permute.xlu0 %1332 }
 0x205   : > { %2238 = vmatprep.mubr.f32.mxu1 %v2045_v45  ;;  %v4209_v28 = vpop.permute.xlu1 %1337 }
 0x208   : > { %2239 = vmatmul.mubr.f32.gmra.mrb[44].mxu1 %v2044_v12  ;;  %v1253_v45 = vpop.permute.xlu0 %1252 }
 0x209   : > { %2243 = vmatprep.mubr.f32.mxu1 %v2047_v0  ;;  %v1258_v12 = vpop.permute.xlu1 %1257  ;;  %v2397_v0 = vlaneseq }
 0x20c   : > { %2244 = vmatmul.mubr.f32.gmra.mrb[46].mxu1 %v2046_v2  ;;  %v1810_v2 = vadd.f32 %v3942_v26, %v1233_v25 }
 0x20d   : > { %2248 = vmatprep.mubr.f32.mxu1 %v2049_v8  ;;  %v4212_v8 = vpop.permute.xlu0 %1342 }
 0x210   : > { %2249 = vmatmul.mubr.f32.gmra.mrb[48].mxu1 %v2048_v24 }
 0x211   : > { %2253 = vmatprep.mubr.f32.mxu1 %v2051_v11  ;;  %v2398_v11 = vshrl.u32 %v2397_v0, 7 }
 0x214   : > { %2254 = vmatmul.mubr.f32.gmra.mrb[50].mxu1 %v2050_v13 }
 0x215   : > { %2258 = vmatprep.mubr.f32.mxu1 %v2053_v17 }
 0x218   : > { %2259 = vmatmul.mubr.f32.gmra.mrb[52].mxu1 %v2052_v4  ;;  %v2403_v4 = vsub.s32 1, %v2398_v11 }
 0x219   : > { %2263 = vmatprep.mubr.f32.mxu1 %v2055_v33  ;;  %v1815_v33 = vadd.f32 %v3940_v38, %v1238_v47 }
 0x21c   : > { %2264 = vmatmul.mubr.f32.gmra.mrb[54].mxu1 %v2054_v19  ;;  %v2321_v19 = vld [vmem:[%s4330_s4] sm:$0x3] }
 0x21d   : > { %2268 = vmatprep.mubr.f32.mxu1 %v2057_v23  ;;  %v2399_v23 = vsub.s32 0, %v2398_v11 }
 0x220   : > { %2269 = vmatmul.mubr.f32.gmra.mrb[56].mxu1 %v2056_v30  ;;  %v4218_v30 = vpop.permute.xlu1 %1347 }
 0x221   : > { %2273 = vmatprep.mubr.f32.mxu1 %v2059_v6 }
 0x224   : > { %2274 = vmatmul.mubr.f32.gmra.mrb[58].mxu1 %v2058_v35  ;;  %v2404_v35 = vrot.slane %v2321_v19, %v2403_v4 }
 0x225   : > { %2278 = vmatprep.mubr.f32.mxu1 %v2061_v22 }
 0x226   : > { %2471 = vmatprep.mubr.f32.mxu0 %v2404_v35 }
 0x228   : > { %2279 = vmatmul.mubr.f32.gmra.mrb[60].mxu1 %v2060_v5  ;;  %v4220_v5 = vrot.slane %v2321_v19, %v2399_v23  ;;  %v1830_v19 = vadd.f32 %v3960_v52, %v1253_v45 }
 0x229   : > { %2283 = vmatprep.mubr.f32.mxu1 %v2063_v39  ;;  %v1263_v39 = vpop.permute.xlu0 %1262 }
 0x22c   : > { %2284 = vmatmul.mubr.f32.gmra.mrb[62].mxu1 %v2062_v46  ;;  %v1820_v46 = vadd.f32 %v3950_v48, %v1243_v44 }
 0x22d   : > { %v4226_v11 = vpop.permute.xlu0 %1352 }
 0x283   : > { %v2130_v24 = vpop.f32.mrb[0].mxu1 }
 0x284   : > { %v2131_v13 = vadd.f32 %v2130_v24, %v1810_v2  ;;  %v2132_v17 = vpop.f32.mrb[1].mxu1  ;;  %v1268_v2 = vpop.permute.xlu1 %1267  ;;  %v1825_v24 = vadd.f32 %v3945_v40, %v1248_v7 }
 0x286   : > { %v2289_v41 = vmax.f32 %v2131_v13, 0.0 }
 0x287   : > { %v2135_v6 = vpop.f32.mrb[2].mxu1 }
 0x288   : > { %v2136_v22 = vadd.f32 %v2135_v6, %v1815_v33  ;;  %v2137_v26 = vpop.f32.mrb[3].mxu1  ;;  %v4229_v48 = vpop.permute.xlu1 %1357 }
 0x289   : > { %v1273_v26 = vpop.permute.xlu0 %1272 }
 0x28a   : > { %v2290_v61 = vmax.f32 %v2136_v22, 0.0 }
 0x28b   : > { %v2140_v38 = vpop.f32.mrb[4].mxu1 }
 0x28c   : > { %v4223_v25 = vpack.c.bf16 %v2290_v61, %v2289_v41  ;;  %v2141_v47 = vadd.f32 %v2140_v38, %v1820_v46  ;;  %v2142_v0 = vpop.f32.mrb[5].mxu1  ;;  %v1835_v46 = vadd.f32 %v3955_v50, %v1258_v12  ;;  %v1278_v61 = vpop.permute.xlu1 %1277  ;;  %v1840_v38 = vadd.f32 %v3970_v55, %v1263_v39 }
 0x28d   : > { %v4235_v45 = vpop.permute.xlu0 %1362 }
 0x28e   : > { %v2291_v23 = vmax.f32 %v2141_v47, 0.0 }
 0x28f   : > { %v2145_v17 = vpop.f32.mrb[6].mxu1 }
 0x290   : > { %v2146_v4 = vadd.f32 %v2145_v17, %v1825_v24  ;;  %v2147_v33 = vpop.f32.mrb[7].mxu1 }
 0x291   : > { %v1845_v33 = vadd.f32 %v3965_v49, %v1268_v2 }
 0x292   : > { %v2292_v6 = vmax.f32 %v2146_v4, 0.0 }
 0x293   : > { %v2150_v44 = vpop.f32.mrb[8].mxu1 }
 0x294   : > { %v4231_v13 = vpack.c.bf16 %v2292_v6, %v2291_v23  ;;  %v2151_v35 = vadd.f32 %v2150_v44, %v1830_v19  ;;  %v2152_v22 = vpop.f32.mrb[9].mxu1  ;;  %v4240_v19 = vpop.permute.xlu1 %1367  ;;  %v1850_v44 = vadd.f32 %v3980_v29, %v1273_v26 }
 0x295   : > { %v1283_v6 = vpop.permute.xlu0 %1282 }
 0x296   : > { %v2293_v0 = vmax.f32 %v2151_v35, 0.0 }
 0x297   : > { %v2155_v40 = vpop.f32.mrb[10].mxu1 }
 0x298   : > { %v2156_v7 = vadd.f32 %v2155_v40, %v1835_v46  ;;  %v2157_v41 = vpop.f32.mrb[11].mxu1 }
 0x299   : > { %v1855_v41 = vadd.f32 %v3975_v42, %v1278_v61 }
 0x29a   : > { %v2294_v52 = vmax.f32 %v2156_v7, 0.0  ;;  %v1288_v7 = vpop.permute.xlu1 %1287 }
 0x29b   : > { %v2160_v47 = vpop.f32.mrb[12].mxu1 }
 0x29c   : > { %v4237_v24 = vpack.c.bf16 %v2294_v52, %v2293_v0  ;;  %v2161_v17 = vadd.f32 %v2160_v47, %v1840_v38  ;;  %v2162_v4 = vpop.f32.mrb[13].mxu1  ;;  %v4246_v38 = vpop.permute.xlu0 %1372  ;;  %v1860_v52 = vadd.f32 %v3990_v58, %v1283_v6 }
 0x29e   : > { %v2295_v55 = vmax.f32 %v2161_v17, 0.0  ;;  %v4249_v29 = vpop.permute.xlu1 %1377 }
 0x29f   : > { %v2165_v50 = vpop.f32.mrb[14].mxu1 }
 0x2a0   : > { %v2166_v12 = vadd.f32 %v2165_v50, %v1845_v33  ;;  %v2167_v23 = vpop.f32.mrb[15].mxu1 }
 0x2a1   : > { %v1865_v23 = vadd.f32 %v3985_v56, %v1288_v7 }
 0x2a2   : > { %v2296_v39 = vmax.f32 %v2166_v12, 0.0  ;;  %v1293_v12 = vpop.permute.xlu0 %1292 }
 0x2a3   : > { %v2170_v35 = vpop.f32.mrb[16].mxu1 }
 0x2a4   : > { %v4243_v22 = vpack.c.bf16 %v2296_v39, %v2295_v55  ;;  %v2171_v46 = vadd.f32 %v2170_v35, %v1850_v44  ;;  %v2172_v40 = vpop.f32.mrb[17].mxu1  ;;  %v1298_v55 = vpop.permute.xlu1 %1297  ;;  %v1870_v39 = vadd.f32 %v4000_v53, %v1293_v12 }
 0x2a6   : > { %v2297_v47 = vmax.f32 %v2171_v46, 0.0  ;;  %v4255_v6 = vpop.permute.xlu0 %1382 }
 0x2a7   : > { %v2175_v49 = vpop.f32.mrb[18].mxu1 }
 0x2a8   : > { %v2176_v2 = vadd.f32 %v2175_v49, %v1855_v41  ;;  %v2177_v0 = vpop.f32.mrb[19].mxu1 }
 0x2a9   : > { %v4260_v0 = vpop.permute.xlu1 %1387 }
 0x2aa   : > { %v2298_v4 = vmax.f32 %v2176_v2, 0.0  ;;  %v1875_v2 = vadd.f32 %v3995_v59, %v1298_v55 }
 0x2ab   : > { %v2180_v26 = vpop.f32.mrb[20].mxu1 }
 0x2ac   : > { %v4251_v17 = vpack.c.bf16 %v2298_v4, %v2297_v47  ;;  %v2181_v33 = vadd.f32 %v2180_v26, %v1860_v52  ;;  %v2182_v50 = vpop.f32.mrb[21].mxu1  ;;  %v1303_v47 = vpop.permute.xlu0 %1302 }
 0x2ad   : > { %v1880_v4 = vadd.f32 %v4010_v63, %v1303_v47 }
 0x2ae   : > { %v2299_v35 = vmax.f32 %v2181_v33, 0.0 }
 0x2af   : > { %v2185_v42 = vpop.f32.mrb[22].mxu1 }
 0x2b0   : > { %v2186_v61 = vadd.f32 %v2185_v42, %v1865_v23  ;;  %v2187_v44 = vpop.f32.mrb[23].mxu1  ;;  %v1308_v42 = vpop.permute.xlu1 %1307 }
 0x2b2   : > { %v2300_v58 = vmax.f32 %v2186_v61, 0.0  ;;  %v1885_v61 = vadd.f32 %v4005_v60, %v1308_v42  ;;  %v1900_v60 = vadd.f32 %v4030_v3, %v4203_v43 }
 0x2b3   : > { %v2190_v46 = vpop.f32.mrb[24].mxu1 }
 0x2b4   : > { %v4257_v40 = vpack.c.bf16 %v2300_v58, %v2299_v35  ;;  %v2191_v41 = vadd.f32 %v2190_v46, %v1870_v39  ;;  %v2192_v49 = vpop.f32.mrb[25].mxu1  ;;  %v1890_v39 = vadd.f32 %v4020_v1, %v4199_v54 }
 0x2b6   : > { %v2301_v53 = vmax.f32 %v2191_v41, 0.0 }
 0x2b7   : > { %v2195_v56 = vpop.f32.mrb[26].mxu1 }
 0x2b8   : > { %v2196_v7 = vadd.f32 %v2195_v56, %v1875_v2  ;;  %v2197_v52 = vpop.f32.mrb[27].mxu1  ;;  %v1895_v2 = vadd.f32 %v4015_v62, %v4201_v51 }
 0x2ba   : > { %v2302_v26 = vmax.f32 %v2196_v7, 0.0 }
 0x2bb   : > { %v2200_v33 = vpop.f32.mrb[28].mxu1 }
 0x2bc   : > { %v4263_v50 = vpack.c.bf16 %v2302_v26, %v2301_v53  ;;  %v2201_v12 = vadd.f32 %v2200_v33, %v1880_v4  ;;  %v2202_v23 = vpop.f32.mrb[29].mxu1  ;;  %v1905_v33 = vadd.f32 %v4025_v9, %v4205_v57 }
 0x2bd   : > { %v1910_v23 = vadd.f32 %v4040_v15, %v4207_v21 }
 0x2be   : > { %v2303_v35 = vmax.f32 %v2201_v12, 0.0 }
 0x2bf   : > { %v2205_v44 = vpop.f32.mrb[30].mxu1 }
 0x2c0   : > { %v2206_v59 = vadd.f32 %v2205_v44, %v1885_v61  ;;  %v2207_v55 = vpop.f32.mrb[31].mxu1 }
 0x2c1   : > { %v1915_v55 = vadd.f32 %v4035_v31, %v4209_v28 }
 0x2c2   : > { %v2304_v58 = vmax.f32 %v2206_v59, 0.0 }
 0x2c3   : > { %v2210_v46 = vpop.f32.mrb[32].mxu1 }
 0x2c4   : > { %v4268_v63 = vpack.c.bf16 %v2304_v58, %v2303_v35  ;;  %v2211_v41 = vadd.f32 %v2210_v46, %v1890_v39  ;;  %v2212_v49 = vpop.f32.mrb[33].mxu1  ;;  %v1920_v39 = vadd.f32 %v4050_v14, %v4212_v8 }
 0x2c5   : > { %v1925_v49 = vadd.f32 %v4045_v16, %v4218_v30 }
 0x2c6   : > { %v2305_v47 = vmax.f32 %v2211_v41, 0.0 }
 0x2c7   : > { %v2215_v56 = vpop.f32.mrb[34].mxu1 }
 0x2c8   : > { %v2216_v7 = vadd.f32 %v2215_v56, %v1895_v2  ;;  %v2217_v52 = vpop.f32.mrb[35].mxu1  ;;  %v1930_v2 = vadd.f32 %v4060_v18, %v4226_v11 }
 0x2ca   : > { %v2306_v4 = vmax.f32 %v2216_v7, 0.0 }
 0x2cb   : > { %v2220_v53 = vpop.f32.mrb[36].mxu1 }
 0x2cc   : > { %v2960_v1 = vpack.c.bf16 %v2306_v4, %v2305_v47  ;;  %v2221_v54 = vadd.f32 %v2220_v53, %v1900_v60  ;;  %v2222_v26 = vpop.f32.mrb[37].mxu1  ;;  %v1935_v47 = vadd.f32 %v4055_v32, %v4229_v48  ;;  %v1940_v4 = vadd.f32 %v4070_v27, %v4235_v45 }
 0x2ce   : > { %2961 = vmatprep.subr.bf16.mxu0 %v2960_v1  ;;  %v2307_v42 = vmax.f32 %v2221_v54, 0.0 }
 0x2cf   : > { %v2225_v12 = vpop.f32.mrb[38].mxu1  ;;  %2963 = vmatpush3.bf16.msra.mxu0 %v4223_v25 }
 0x2d0   : > { %v2226_v62 = vadd.f32 %v2225_v12, %v1905_v33  ;;  %v2227_v51 = vpop.f32.mrb[39].mxu1  ;;  %v1945_v33 = vadd.f32 %v4065_v20, %v4240_v19  ;;  %v1950_v12 = vadd.f32 %v4080_v34, %v4246_v38 }
 0x2d2   : > { %v2308_v3 = vmax.f32 %v2226_v62, 0.0 }
 0x2d3   : > { %v2230_v43 = vpop.f32.mrb[40].mxu1 }
 0x2d4   : > { %v2964_v61 = vpack.c.bf16 %v2308_v3, %v2307_v42  ;;  %v2231_v44 = vadd.f32 %v2230_v43, %v1910_v23  ;;  %v2232_v59 = vpop.f32.mrb[41].mxu1  ;;  %v1955_v3 = vadd.f32 %v4075_v10, %v4249_v29  ;;  %v1960_v43 = vadd.f32 %v4090_v37, %v4255_v6  ;;  %v2392_v6 = vpop.f32.mrb[64].mxu0 }
 0x2d6   : > { %2965 = vmatprep.subr.bf16.mxu0 %v2964_v61  ;;  %v2309_v35 = vmax.f32 %v2231_v44, 0.0 }
 0x2d7   : > { %v2235_v9 = vpop.f32.mrb[42].mxu1  ;;  %2967 = vmatpush3.bf16.msra.mxu0 %v4231_v13 }
 0x2d8   : > { %v2236_v57 = vadd.f32 %v2235_v9, %v1915_v55  ;;  %v2237_v25 = vpop.f32.mrb[43].mxu1  ;;  %v1965_v9 = vadd.f32 %v4085_v36, %v4260_v0 }
 0x2da   : > { %v2310_v15 = vmax.f32 %v2236_v57, 0.0 }
 0x2db   : > { %v2240_v21 = vpop.f32.mrb[44].mxu1 }
 0x2dc   : > { %v2968_v58 = vpack.c.bf16 %v2310_v15, %v2309_v35  ;;  %v2241_v46 = vadd.f32 %v2240_v21, %v1920_v39  ;;  %v2242_v41 = vpop.f32.mrb[45].mxu1  ;;  %v2883_v39 = vpop.f32.mrb[65].mxu0  ;;  %v2478_v35 = vstv %s2477_s26 }
 0x2de   : > { %2969 = vmatprep.subr.bf16.mxu0 %v2968_v58  ;;  %v2311_v56 = vmax.f32 %v2241_v46, 0.0 }
 0x2df   : > { %v2245_v31 = vpop.f32.mrb[46].mxu1  ;;  %2971 = vmatpush3.bf16.msra.mxu0 %v4237_v24 }
 0x2e0   : > { %v2246_v28 = vadd.f32 %v2245_v31, %v1925_v49  ;;  %v2247_v13 = vpop.f32.mrb[47].mxu1 }
 0x2e2   : > { %v2312_v14 = vmax.f32 %v2246_v28, 0.0 }
 0x2e3   : > { %v2250_v8 = vpop.f32.mrb[48].mxu1 }
 0x2e4   : > { %v2972_v7 = vpack.c.bf16 %v2312_v14, %v2311_v56  ;;  %v2251_v52 = vadd.f32 %v2250_v8, %v1930_v2  ;;  %v2252_v60 = vpop.f32.mrb[49].mxu1 }
 0x2e6   : > { %2973 = vmatprep.subr.bf16.mxu0 %v2972_v7  ;;  %v2313_v53 = vmax.f32 %v2251_v52, 0.0 }
 0x2e7   : > { %v2255_v16 = vpop.f32.mrb[50].mxu1  ;;  %2975 = vmatpush3.bf16.msra.mxu0 %v4243_v22 }
 0x2e8   : > { %v2256_v30 = vadd.f32 %v2255_v16, %v1935_v47  ;;  %v2257_v24 = vpop.f32.mrb[51].mxu1 }
 0x2ea   : > { %v2314_v18 = vmax.f32 %v2256_v30, 0.0 }
 0x2eb   : > { %v2260_v11 = vpop.f32.mrb[52].mxu1 }
 0x2ec   : > { %v2976_v1 = vpack.c.bf16 %v2314_v18, %v2313_v53  ;;  %v2261_v54 = vadd.f32 %v2260_v11, %v1940_v4  ;;  %v2262_v26 = vpop.f32.mrb[53].mxu1 }
 0x2ee   : > { %2977 = vmatprep.subr.bf16.mxu0 %v2976_v1  ;;  %v2315_v62 = vmax.f32 %v2261_v54, 0.0 }
 0x2ef   : > { %v2265_v32 = vpop.f32.mrb[54].mxu1  ;;  %2979 = vmatpush3.bf16.msra.mxu0 %v4251_v17 }
 0x2f0   : > { %v2266_v48 = vadd.f32 %v2265_v32, %v1945_v33  ;;  %v2267_v22 = vpop.f32.mrb[55].mxu1 }
 0x2f2   : > { %v2316_v27 = vmax.f32 %v2266_v48, 0.0 }
 0x2f3   : > { %v2270_v45 = vpop.f32.mrb[56].mxu1 }
 0x2f4   : > { %v2980_v51 = vpack.c.bf16 %v2316_v27, %v2315_v62  ;;  %v2271_v23 = vadd.f32 %v2270_v45, %v1950_v12  ;;  %v2272_v42 = vpop.f32.mrb[57].mxu1 }
 0x2f6   : > { %2981 = vmatprep.subr.bf16.mxu0 %v2980_v51  ;;  %v2317_v61 = vmax.f32 %v2271_v23, 0.0 }
 0x2f7   : > { %v2275_v20 = vpop.f32.mrb[58].mxu1  ;;  %2983 = vmatpush3.bf16.msra.mxu0 %v4257_v40 }
 0x2f8   : > { %v2276_v19 = vadd.f32 %v2275_v20, %v1955_v3  ;;  %v2277_v17 = vpop.f32.mrb[59].mxu1 }
 0x2fa   : > { %v2318_v34 = vmax.f32 %v2276_v19, 0.0 }
 0x2fb   : > { %v2280_v38 = vpop.f32.mrb[60].mxu1 }
 0x2fc   : > { %v2984_v44 = vpack.c.bf16 %v2318_v34, %v2317_v61  ;;  %v2281_v59 = vadd.f32 %v2280_v38, %v1960_v43  ;;  %v2282_v55 = vpop.f32.mrb[61].mxu1 }
 0x2fe   : > { %2985 = vmatprep.subr.bf16.mxu0 %v2984_v44  ;;  %v2319_v57 = vmax.f32 %v2281_v59, 0.0 }
 0x2ff   : > { %v2285_v10 = vpop.f32.mrb[62].mxu1  ;;  %2987 = vmatpush3.bf16.msra.mxu0 %v4263_v50 }
 0x300   : > { %v2286_v29 = vadd.f32 %v2285_v10, %v1965_v9  ;;  %v2287_v40 = vpop.f32.mrb[63].mxu1 }
 0x302   : > { %v2320_v25 = vmax.f32 %v2286_v29, 0.0 }
 0x304   : > { %v2988_v37 = vpack.c.bf16 %v2320_v25, %v2319_v57 }
 0x306   : > { %2989 = vmatprep.subr.bf16.mxu0 %v2988_v37 }
 0x307   : > { %2991 = vmatpush3.bf16.msra.mxu0 %v4268_v63 }
 0x30a   : > { %2472 = vmatmul.mubr.f32.vlgmr.msra.gmra.mrb[66].mxu0 %v4220_v5 }
 0x3dd   : > { %v2746_v36 = vpop.f32.mrb[66].mxu0 }
 0x3de   : > { %v2747_v0 = vpop.f32.mrb[67].mxu0 }
 0x3df   : > { %v2748_v50 = vadd.f32 %v2747_v0, %v2746_v36 }
 0x3e1   : > { %v2474_v15 = vadd.f32 %v2748_v50, %v2392_v6 }
 0x3e3   : > { %v2479_v21 = vadd.f32 %v2478_v35, %v2474_v15 }
 0x3e5   : > { %2480 = vst [vmem:[%s317_s12] sm:$0x1] %v2479_v21 }
 0x3e6 PF: > { %p15_p9 = scmp.ge.s32.totalorder %s3148_s29, 5   ;;  %s4336_s26 = smov %s3072_s27 }
 0x3e7   : > { %s4337_s27 = smov %s3157_s9  ;;  %s4338_s28 = smov %s3148_s29 }
 0x3e8   :  { %17 = sbr.rel (!%p15_p9) target bundleno = 4 (0x4), region = 121 }

</bundles_post_ra>
